<compile_context>
chip_gen: v7x
topology: tpu7x:2x2x1
jax: 0.10.0
libtpu: 0.0.40
codegen_flags: <defaults>
</compile_context>

<pallas_src>
import functools

import jax
import jax.numpy as jnp
from jax.experimental import pallas as pl
from jax.experimental.pallas import tpu as pltpu


def _network1_kernel(H, W,
                     masks_ref, x_ref, w1_ref, b1_ref, w2_ref, b2_ref,
                     w3_ref, b3_ref, out_ref, p2_ref):
    # masks_ref: (8, L)            per-image SAME border masks (grid-invariant)
    # x_ref    : (1, Cin_pad, L)   C on sublanes, imgs_per_step*H*W on lanes
    # w1_ref   : (Cemb, 9*Cin_pad) conv1 weights, im2col-collapsed, transposed
    # w2_ref   : (Cemb, 9*Cemb)    conv2 weights, im2col-collapsed, transposed
    # w3_ref   : (Cout, Cemb)      1x1 conv weights, transposed
    # b*_ref   : (C, 1)            biases (kept f32 for the VPU work)
    # out_ref  : (1, Cout, L)      lane-dense output block
    # p2_ref   : (9*Cemb, L)       persistent VMEM scratch: conv2 im2col operand
    L = x_ref.shape[2]
    Cemb = w2_ref.shape[0]
    mm_dtype = p2_ref.dtype
    slope = jnp.float32(0.2)

    # 3x3 tap table: lane shift on the folded pixel axis + mask row (None for
    # the center tap).  The precomputed per-image masks zero both the SAME
    # border and any roll wrap-around across image boundaries.
    taps = []
    m = 0
    for ky in range(3):
        for kx in range(3):
            dy, dx = ky - 1, kx - 1
            if dy == 0 and dx == 0:
                taps.append((0, None))
            else:
                taps.append(((-(dy * W + dx)) % L, m))
                m += 1

    def tap(a, shift, mrow):
        if mrow is None:
            return a
        shifted = pltpu.roll(a, shift=shift, axis=1)          # XLU lane roll
        return shifted * masks_ref[mrow:mrow + 1, :]          # (C,L)*(1,L)

    def lrelu(v):
        return jnp.maximum(v, slope * v)

    x = x_ref[0]                                              # (Cin_pad, L) f32

    # ---- conv1: 3x3 SAME, Cin_pad -> Cemb : ONE matmul, K = 9*Cin_pad ----
    # (each tap block is a full aligned sublane tile thanks to the Cin pad)
    p1 = jnp.concatenate(
        [tap(x, s, mi).astype(mm_dtype) for s, mi in taps], axis=0)
    h1 = lrelu(jnp.dot(w1_ref[...], p1,
                       preferred_element_type=jnp.float32) + b1_ref[...])

    # ---- conv2: 3x3 SAME, Cemb -> Cemb : taps stored into persistent VMEM
    # scratch, then ONE matmul with K = 9*Cemb ----
    for t, (s, mi) in enumerate(taps):
        p2_ref[t * Cemb:(t + 1) * Cemb, :] = tap(h1, s, mi).astype(mm_dtype)
    h2 = lrelu(jnp.dot(w2_ref[...], p2_ref[...],
                       preferred_element_type=jnp.float32) + b2_ref[...])

    # ---- conv3: 1x1, Cemb -> Cout (no activation); lane-dense store ----
    out = jnp.dot(w3_ref[...], h2.astype(mm_dtype),
                  preferred_element_type=jnp.float32) + b3_ref[...]
    out_ref[0, :, :] = out.astype(out_ref.dtype)


def network1_pallas(x_nchw, params, *, matmul_dtype=jnp.float32,
                    imgs_per_step=None):
    """x_nchw: (N, Cin, H, W) float32.  Returns (N, Cout, H, W) float32."""
    w1, b1, w2, b2, w3, b3 = params
    N, Cin, H, W = x_nchw.shape
    Cemb = w1.shape[3]
    Cout = w3.shape[1]
    HW = H * W

    # Pad Cin to a full sublane tile so each conv1 im2col tap block is an
    # aligned store (8 rows for f32 matmul operands, 16 for packed bf16).
    tile = 8 if jnp.dtype(matmul_dtype) == jnp.dtype(jnp.float32) else 16
    Cin_pad = max(tile, ((Cin + tile - 1) // tile) * tile)

    # Fold images along the lane axis: fewer, fatter grid steps, but keep
    # >= 2 parallel steps when possible so both v7x TensorCores get work
    # (v5e/v6e have a single TC, where one fat step would also be fine).
    if imgs_per_step is None:
        imgs_per_step = 1
        for d in range(1, N + 1):
            if N % d == 0 and N // d >= 2:
                imgs_per_step = d
    assert N % imgs_per_step == 0
    num_steps = N // imgs_per_step
    L = imgs_per_step * HW

    x = x_nchw.astype(jnp.float32)
    if Cin_pad != Cin:
        x = jnp.pad(x, ((0, 0), (0, Cin_pad - Cin), (0, 0), (0, 0)))
    # (N,Cp,H,W) -> (steps, Cp, imgs*HW); the transpose is a no-op when imgs==1.
    x_fold = (x.reshape(num_steps, imgs_per_step, Cin_pad, HW)
              .transpose(0, 2, 1, 3)
              .reshape(num_steps, Cin_pad, L))

    # Grid-invariant per-image SAME border masks (one row per non-center tap),
    # derived from lane % HW so they are correct under lane-axis batch folding.
    pix = jnp.arange(L, dtype=jnp.int32) % HW
    yy, xx = pix // W, pix % W
    rows = []
    for ky in range(3):
        for kx in range(3):
            dy, dx = ky - 1, kx - 1
            if dy == 0 and dx == 0:
                continue
            rows.append(((yy + dy >= 0) & (yy + dy < H) &
                         (xx + dx >= 0) & (xx + dx < W)).astype(jnp.float32))
    masks = jnp.stack(rows, axis=0)                           # (8, L)

    # Fold 3x3 HWIO weights into transposed im2col form:
    #   Wcol[e, (ky*3+kx)*C + c] = w_hwio[ky, kx, c, e].
    w1p = jnp.pad(w1, ((0, 0), (0, 0), (0, Cin_pad - Cin), (0, 0)))
    w1col = jnp.transpose(w1p, (3, 0, 1, 2)).reshape(Cemb, 9 * Cin_pad)
    w2col = jnp.transpose(w2, (3, 0, 1, 2)).reshape(Cemb, 9 * Cemb)
    w1col = w1col.astype(matmul_dtype)
    w2col = w2col.astype(matmul_dtype)
    w3t = w3.T.astype(matmul_dtype)                           # (Cout, Cemb)
    b1c = b1.reshape(Cemb, 1).astype(jnp.float32)
    b2c = b2.reshape(Cemb, 1).astype(jnp.float32)
    b3c = b3.reshape(Cout, 1).astype(jnp.float32)

    full = lambda shape: pl.BlockSpec(shape, lambda n: (0,) * len(shape))
    kernel = functools.partial(_network1_kernel, H, W)

    out_fold = pl.pallas_call(
        kernel,
        out_shape=jax.ShapeDtypeStruct((num_steps, Cout, L), jnp.float32),
        grid_spec=pltpu.PrefetchScalarGridSpec(
            num_scalar_prefetch=0,
            grid=(num_steps,),
            in_specs=[
                full((8, L)),                                  # resident masks
                pl.BlockSpec((1, Cin_pad, L), lambda n: (n, 0, 0)),
                full((Cemb, 9 * Cin_pad)),
                full((Cemb, 1)),
                full((Cemb, 9 * Cemb)),
                full((Cemb, 1)),
                full((Cout, Cemb)),
                full((Cout, 1)),
            ],
            out_specs=pl.BlockSpec((1, Cout, L), lambda n: (n, 0, 0)),
            scratch_shapes=[pltpu.VMEM((9 * Cemb, L), matmul_dtype)],
        ),
        compiler_params=pltpu.CompilerParams(
            dimension_semantics=("parallel",),
            vmem_limit_bytes=32 * 1024 * 1024),
    )(masks, x_fold, w1col, b1c, w2col, b2c, w3t, b3c)

    # Unfold back to NCHW (free reshape when imgs_per_step == 1).
    return (out_fold.reshape(num_steps, Cout, imgs_per_step, HW)
            .transpose(0, 2, 1, 3)
            .reshape(N, Cout, H, W))


def init_params(key, n_chan, chan_embed=48):
    """Deterministic synthetic init (shapes match nn.Conv2d weights, HWIO)."""
    k1, k2, k3, k4, k5, k6 = jax.random.split(key, 6)
    s1 = 1.0 / (n_chan * 9) ** 0.5
    s2 = 1.0 / (chan_embed * 9) ** 0.5
    s3 = 1.0 / chan_embed ** 0.5
    w1 = jax.random.uniform(k1, (3, 3, n_chan, chan_embed), jnp.float32, -s1, s1)
    b1 = jax.random.uniform(k2, (chan_embed,), jnp.float32, -s1, s1)
    w2 = jax.random.uniform(k3, (3, 3, chan_embed, chan_embed), jnp.float32, -s2, s2)
    b2 = jax.random.uniform(k4, (chan_embed,), jnp.float32, -s2, s2)
    w3 = jax.random.uniform(k5, (chan_embed, n_chan), jnp.float32, -s3, s3)
    b3 = jax.random.uniform(k6, (n_chan,), jnp.float32, -s3, s3)
    return (w1, b1, w2, b2, w3, b3)


def _reference_forward(x_nchw, params):
    """Pure-JAX reference (lax conv) for correctness check."""
    w1, b1, w2, b2, w3, b3 = params
    x = jnp.transpose(x_nchw, (0, 2, 3, 1))
    dn = ("NHWC", "HWIO", "NHWC")
    lrelu = lambda v: jnp.where(v > 0, v, 0.2 * v)
    y = jax.lax.conv_general_dilated(x, w1, (1, 1), "SAME",
                                     dimension_numbers=dn) + b1
    y = lrelu(y)
    y = jax.lax.conv_general_dilated(y, w2, (1, 1), "SAME",
                                     dimension_numbers=dn) + b2
    y = lrelu(y)
    y = jax.lax.conv_general_dilated(y, w3[None, None], (1, 1), "SAME",
                                     dimension_numbers=dn) + b3
    return jnp.transpose(y, (0, 3, 1, 2))


if __name__ == "__main__":
    key = jax.random.PRNGKey(0)
    kx, kp = jax.random.split(key)

    N, n_chan, H, W = 2, 4, 16, 16
    chan_embed = 48
    x = jax.random.normal(kx, (N, n_chan, H, W), jnp.float32)   # NCHW like PyTorch
    params = init_params(kp, n_chan, chan_embed)

    ref = jax.block_until_ready(_reference_forward(x, params))

    # Default f32 matmul operands: exact vs. the f32 reference.
    out = jax.block_until_ready(network1_pallas(x, params))
    assert out.shape == (N, n_chan, H, W)
    assert jnp.allclose(out, ref, rtol=1e-4, atol=1e-4), "f32 mismatch vs reference"

    # bf16 matmul operands (f32 accumulation) — the MXU lever for large
    # H*W / folded batches; verified at a bf16-appropriate tolerance.
    out_bf16 = jax.block_until_ready(
        network1_pallas(x, params, matmul_dtype=jnp.bfloat16))
    assert jnp.allclose(out_bf16, ref, rtol=5e-2, atol=5e-2), "bf16 mismatch vs reference"

    print("KERNEL_OK")
</pallas_src>

<mosaic_0001>
module attributes {stable_mosaic.version = 11 : i64} {
  func.func @_network1_kernel(%arg0: i32, %arg1: memref<8x256xf32, #tpu.memory_space<vmem>>, %arg2: memref<1x8x256xf32, #tpu.memory_space<vmem>>, %arg3: memref<48x72xf32, #tpu.memory_space<vmem>>, %arg4: memref<48x1xf32, #tpu.memory_space<vmem>>, %arg5: memref<48x432xf32, #tpu.memory_space<vmem>>, %arg6: memref<48x1xf32, #tpu.memory_space<vmem>>, %arg7: memref<4x48xf32, #tpu.memory_space<vmem>>, %arg8: memref<4x1xf32, #tpu.memory_space<vmem>>, %arg9: memref<1x4x256xf32, #tpu.memory_space<vmem>>, %arg10: memref<432x256xf32, #tpu.memory_space<vmem>>) attributes {dimension_semantics = [#tpu.dimension_semantics<parallel>], iteration_bounds = array<i64: 2>, scalar_prefetch = 0 : i64, scratch_operands = 1 : i64, tpu.core_type = #tpu.core_type<tc>, window_params = [{pipeline_mode = #tpu.pipeline_mode<synchronous>, transform_indices = @transform_0, window_bounds = array<i64: 8, 256>}, {transform_indices = @transform_1, window_bounds = array<i64: 1, 8, 256>}, {pipeline_mode = #tpu.pipeline_mode<synchronous>, transform_indices = @transform_2, window_bounds = array<i64: 48, 72>}, {pipeline_mode = #tpu.pipeline_mode<synchronous>, transform_indices = @transform_3, window_bounds = array<i64: 48, 1>}, {pipeline_mode = #tpu.pipeline_mode<synchronous>, transform_indices = @transform_4, window_bounds = array<i64: 48, 432>}, {pipeline_mode = #tpu.pipeline_mode<synchronous>, transform_indices = @transform_5, window_bounds = array<i64: 48, 1>}, {pipeline_mode = #tpu.pipeline_mode<synchronous>, transform_indices = @transform_6, window_bounds = array<i64: 4, 48>}, {pipeline_mode = #tpu.pipeline_mode<synchronous>, transform_indices = @transform_7, window_bounds = array<i64: 4, 1>}, {transform_indices = @transform_8, window_bounds = array<i64: 1, 4, 256>}]} {
    %c0 = arith.constant 0 : index
    %c0_0 = arith.constant 0 : index
    %c0_1 = arith.constant 0 : index
    %0 = vector.load %arg2[%c0, %c0_0, %c0_1] : memref<1x8x256xf32, #tpu.memory_space<vmem>>, vector<1x8x256xf32>
    %1 = vector.shape_cast %0 : vector<1x8x256xf32> to vector<8x256xf32>
    %c17_i32 = arith.constant 17 : i32
    %2 = tpu.dynamic_rotate %1 by %c17_i32 dim 1 : vector<8x256xf32>, i32 -> vector<8x256xf32>
    %c0_2 = arith.constant 0 : index
    %c0_3 = arith.constant 0 : index
    %3 = vector.load %arg1[%c0_2, %c0_3] : memref<8x256xf32, #tpu.memory_space<vmem>>, vector<1x256xf32>
    %4 = vector.broadcast %3 : vector<1x256xf32> to vector<8x256xf32>
    %5 = arith.mulf %2, %4 : vector<8x256xf32>
    %c16_i32 = arith.constant 16 : i32
    %6 = tpu.dynamic_rotate %1 by %c16_i32 dim 1 : vector<8x256xf32>, i32 -> vector<8x256xf32>
    %c1 = arith.constant 1 : index
    %c0_4 = arith.constant 0 : index
    %7 = vector.load %arg1[%c1, %c0_4] : memref<8x256xf32, #tpu.memory_space<vmem>>, vector<1x256xf32>
    %8 = vector.broadcast %7 : vector<1x256xf32> to vector<8x256xf32>
    %9 = arith.mulf %6, %8 : vector<8x256xf32>
    %c15_i32 = arith.constant 15 : i32
    %10 = tpu.dynamic_rotate %1 by %c15_i32 dim 1 : vector<8x256xf32>, i32 -> vector<8x256xf32>
    %c2 = arith.constant 2 : index
    %c0_5 = arith.constant 0 : index
    %11 = vector.load %arg1[%c2, %c0_5] : memref<8x256xf32, #tpu.memory_space<vmem>>, vector<1x256xf32>
    %12 = vector.broadcast %11 : vector<1x256xf32> to vector<8x256xf32>
    %13 = arith.mulf %10, %12 : vector<8x256xf32>
    %c1_i32 = arith.constant 1 : i32
    %14 = tpu.dynamic_rotate %1 by %c1_i32 dim 1 : vector<8x256xf32>, i32 -> vector<8x256xf32>
    %c3 = arith.constant 3 : index
    %c0_6 = arith.constant 0 : index
    %15 = vector.load %arg1[%c3, %c0_6] : memref<8x256xf32, #tpu.memory_space<vmem>>, vector<1x256xf32>
    %16 = vector.broadcast %15 : vector<1x256xf32> to vector<8x256xf32>
    %17 = arith.mulf %14, %16 : vector<8x256xf32>
    %c255_i32 = arith.constant 255 : i32
    %18 = tpu.dynamic_rotate %1 by %c255_i32 dim 1 : vector<8x256xf32>, i32 -> vector<8x256xf32>
    %c4 = arith.constant 4 : index
    %c0_7 = arith.constant 0 : index
    %19 = vector.load %arg1[%c4, %c0_7] : memref<8x256xf32, #tpu.memory_space<vmem>>, vector<1x256xf32>
    %20 = vector.broadcast %19 : vector<1x256xf32> to vector<8x256xf32>
    %21 = arith.mulf %18, %20 : vector<8x256xf32>
    %c241_i32 = arith.constant 241 : i32
    %22 = tpu.dynamic_rotate %1 by %c241_i32 dim 1 : vector<8x256xf32>, i32 -> vector<8x256xf32>
    %c5 = arith.constant 5 : index
    %c0_8 = arith.constant 0 : index
    %23 = vector.load %arg1[%c5, %c0_8] : memref<8x256xf32, #tpu.memory_space<vmem>>, vector<1x256xf32>
    %24 = vector.broadcast %23 : vector<1x256xf32> to vector<8x256xf32>
    %25 = arith.mulf %22, %24 : vector<8x256xf32>
    %c240_i32 = arith.constant 240 : i32
    %26 = tpu.dynamic_rotate %1 by %c240_i32 dim 1 : vector<8x256xf32>, i32 -> vector<8x256xf32>
    %c6 = arith.constant 6 : index
    %c0_9 = arith.constant 0 : index
    %27 = vector.load %arg1[%c6, %c0_9] : memref<8x256xf32, #tpu.memory_space<vmem>>, vector<1x256xf32>
    %28 = vector.broadcast %27 : vector<1x256xf32> to vector<8x256xf32>
    %29 = arith.mulf %26, %28 : vector<8x256xf32>
    %c239_i32 = arith.constant 239 : i32
    %30 = tpu.dynamic_rotate %1 by %c239_i32 dim 1 : vector<8x256xf32>, i32 -> vector<8x256xf32>
    %c7 = arith.constant 7 : index
    %c0_10 = arith.constant 0 : index
    %31 = vector.load %arg1[%c7, %c0_10] : memref<8x256xf32, #tpu.memory_space<vmem>>, vector<1x256xf32>
    %32 = vector.broadcast %31 : vector<1x256xf32> to vector<8x256xf32>
    %33 = arith.mulf %30, %32 : vector<8x256xf32>
    %34 = tpu.concatenate %5, %9, %13, %17, %1, %21, %25, %29, %33 in 0 : vector<8x256xf32>, vector<8x256xf32>, vector<8x256xf32>, vector<8x256xf32>, vector<8x256xf32>, vector<8x256xf32>, vector<8x256xf32>, vector<8x256xf32>, vector<8x256xf32> -> vector<72x256xf32>
    %c0_11 = arith.constant 0 : index
    %c0_12 = arith.constant 0 : index
    %35 = vector.load %arg3[%c0_11, %c0_12] : memref<48x72xf32, #tpu.memory_space<vmem>>, vector<48x72xf32>
    %cst = arith.constant dense<0.000000e+00> : vector<48x256xf32>
    %36 = tpu.matmul %35, %34, %cst {dimension_numbers = #tpu.dot_dimension_numbers<[1], [0], [0], [1], [0, 0, 1, 1], [], []>} : vector<48x72xf32>, vector<72x256xf32>, vector<48x256xf32> -> vector<48x256xf32>
    %c0_13 = arith.constant 0 : index
    %c0_14 = arith.constant 0 : index
    %37 = vector.load %arg4[%c0_13, %c0_14] : memref<48x1xf32, #tpu.memory_space<vmem>>, vector<48x1xf32>
    %38 = vector.broadcast %37 : vector<48x1xf32> to vector<48x256xf32>
    %39 = arith.addf %36, %38 : vector<48x256xf32>
    %cst_15 = arith.constant 2.000000e-01 : f32
    %40 = vector.broadcast %cst_15 : f32 to vector<48x256xf32>
    %41 = arith.mulf %40, %39 : vector<48x256xf32>
    %42 = arith.maximumf %39, %41 : vector<48x256xf32>
    %c17_i32_16 = arith.constant 17 : i32
    %43 = tpu.dynamic_rotate %42 by %c17_i32_16 dim 1 : vector<48x256xf32>, i32 -> vector<48x256xf32>
    %c0_17 = arith.constant 0 : index
    %c0_18 = arith.constant 0 : index
    %44 = vector.load %arg1[%c0_17, %c0_18] : memref<8x256xf32, #tpu.memory_space<vmem>>, vector<1x256xf32>
    %45 = vector.broadcast %44 : vector<1x256xf32> to vector<48x256xf32>
    %46 = arith.mulf %43, %45 : vector<48x256xf32>
    %c0_19 = arith.constant 0 : index
    %c0_20 = arith.constant 0 : index
    %47 = vector.load %arg10[%c0_19, %c0_20] : memref<432x256xf32, #tpu.memory_space<vmem>>, vector<48x256xf32>
    tpu.vector_store %arg10[%c0_19, %c0_20], %46 {strides = array<i32>} : memref<432x256xf32, #tpu.memory_space<vmem>>, vector<48x256xf32>,
    %c16_i32_21 = arith.constant 16 : i32
    %48 = tpu.dynamic_rotate %42 by %c16_i32_21 dim 1 : vector<48x256xf32>, i32 -> vector<48x256xf32>
    %c1_22 = arith.constant 1 : index
    %c0_23 = arith.constant 0 : index
    %49 = vector.load %arg1[%c1_22, %c0_23] : memref<8x256xf32, #tpu.memory_space<vmem>>, vector<1x256xf32>
    %50 = vector.broadcast %49 : vector<1x256xf32> to vector<48x256xf32>
    %51 = arith.mulf %48, %50 : vector<48x256xf32>
    %c48 = arith.constant 48 : index
    %c0_24 = arith.constant 0 : index
    %52 = vector.load %arg10[%c48, %c0_24] : memref<432x256xf32, #tpu.memory_space<vmem>>, vector<48x256xf32>
    tpu.vector_store %arg10[%c48, %c0_24], %51 {strides = array<i32>} : memref<432x256xf32, #tpu.memory_space<vmem>>, vector<48x256xf32>,
    %c15_i32_25 = arith.constant 15 : i32
    %53 = tpu.dynamic_rotate %42 by %c15_i32_25 dim 1 : vector<48x256xf32>, i32 -> vector<48x256xf32>
    %c2_26 = arith.constant 2 : index
    %c0_27 = arith.constant 0 : index
    %54 = vector.load %arg1[%c2_26, %c0_27] : memref<8x256xf32, #tpu.memory_space<vmem>>, vector<1x256xf32>
    %55 = vector.broadcast %54 : vector<1x256xf32> to vector<48x256xf32>
    %56 = arith.mulf %53, %55 : vector<48x256xf32>
    %c96 = arith.constant 96 : index
    %c0_28 = arith.constant 0 : index
    %57 = vector.load %arg10[%c96, %c0_28] : memref<432x256xf32, #tpu.memory_space<vmem>>, vector<48x256xf32>
    tpu.vector_store %arg10[%c96, %c0_28], %56 {strides = array<i32>} : memref<432x256xf32, #tpu.memory_space<vmem>>, vector<48x256xf32>,
    %c1_i32_29 = arith.constant 1 : i32
    %58 = tpu.dynamic_rotate %42 by %c1_i32_29 dim 1 : vector<48x256xf32>, i32 -> vector<48x256xf32>
    %c3_30 = arith.constant 3 : index
    %c0_31 = arith.constant 0 : index
    %59 = vector.load %arg1[%c3_30, %c0_31] : memref<8x256xf32, #tpu.memory_space<vmem>>, vector<1x256xf32>
    %60 = vector.broadcast %59 : vector<1x256xf32> to vector<48x256xf32>
    %61 = arith.mulf %58, %60 : vector<48x256xf32>
    %c144 = arith.constant 144 : index
    %c0_32 = arith.constant 0 : index
    %62 = vector.load %arg10[%c144, %c0_32] : memref<432x256xf32, #tpu.memory_space<vmem>>, vector<48x256xf32>
    tpu.vector_store %arg10[%c144, %c0_32], %61 {strides = array<i32>} : memref<432x256xf32, #tpu.memory_space<vmem>>, vector<48x256xf32>,
    %c192 = arith.constant 192 : index
    %c0_33 = arith.constant 0 : index
    %63 = vector.load %arg10[%c192, %c0_33] : memref<432x256xf32, #tpu.memory_space<vmem>>, vector<48x256xf32>
    tpu.vector_store %arg10[%c192, %c0_33], %42 {strides = array<i32>} : memref<432x256xf32, #tpu.memory_space<vmem>>, vector<48x256xf32>,
    %c255_i32_34 = arith.constant 255 : i32
    %64 = tpu.dynamic_rotate %42 by %c255_i32_34 dim 1 : vector<48x256xf32>, i32 -> vector<48x256xf32>
    %c4_35 = arith.constant 4 : index
    %c0_36 = arith.constant 0 : index
    %65 = vector.load %arg1[%c4_35, %c0_36] : memref<8x256xf32, #tpu.memory_space<vmem>>, vector<1x256xf32>
    %66 = vector.broadcast %65 : vector<1x256xf32> to vector<48x256xf32>
    %67 = arith.mulf %64, %66 : vector<48x256xf32>
    %c240 = arith.constant 240 : index
    %c0_37 = arith.constant 0 : index
    %68 = vector.load %arg10[%c240, %c0_37] : memref<432x256xf32, #tpu.memory_space<vmem>>, vector<48x256xf32>
    tpu.vector_store %arg10[%c240, %c0_37], %67 {strides = array<i32>} : memref<432x256xf32, #tpu.memory_space<vmem>>, vector<48x256xf32>,
    %c241_i32_38 = arith.constant 241 : i32
    %69 = tpu.dynamic_rotate %42 by %c241_i32_38 dim 1 : vector<48x256xf32>, i32 -> vector<48x256xf32>
    %c5_39 = arith.constant 5 : index
    %c0_40 = arith.constant 0 : index
    %70 = vector.load %arg1[%c5_39, %c0_40] : memref<8x256xf32, #tpu.memory_space<vmem>>, vector<1x256xf32>
    %71 = vector.broadcast %70 : vector<1x256xf32> to vector<48x256xf32>
    %72 = arith.mulf %69, %71 : vector<48x256xf32>
    %c288 = arith.constant 288 : index
    %c0_41 = arith.constant 0 : index
    %73 = vector.load %arg10[%c288, %c0_41] : memref<432x256xf32, #tpu.memory_space<vmem>>, vector<48x256xf32>
    tpu.vector_store %arg10[%c288, %c0_41], %72 {strides = array<i32>} : memref<432x256xf32, #tpu.memory_space<vmem>>, vector<48x256xf32>,
    %c240_i32_42 = arith.constant 240 : i32
    %74 = tpu.dynamic_rotate %42 by %c240_i32_42 dim 1 : vector<48x256xf32>, i32 -> vector<48x256xf32>
    %c6_43 = arith.constant 6 : index
    %c0_44 = arith.constant 0 : index
    %75 = vector.load %arg1[%c6_43, %c0_44] : memref<8x256xf32, #tpu.memory_space<vmem>>, vector<1x256xf32>
    %76 = vector.broadcast %75 : vector<1x256xf32> to vector<48x256xf32>
    %77 = arith.mulf %74, %76 : vector<48x256xf32>
    %c336 = arith.constant 336 : index
    %c0_45 = arith.constant 0 : index
    %78 = vector.load %arg10[%c336, %c0_45] : memref<432x256xf32, #tpu.memory_space<vmem>>, vector<48x256xf32>
    tpu.vector_store %arg10[%c336, %c0_45], %77 {strides = array<i32>} : memref<432x256xf32, #tpu.memory_space<vmem>>, vector<48x256xf32>,
    %c239_i32_46 = arith.constant 239 : i32
    %79 = tpu.dynamic_rotate %42 by %c239_i32_46 dim 1 : vector<48x256xf32>, i32 -> vector<48x256xf32>
    %c7_47 = arith.constant 7 : index
    %c0_48 = arith.constant 0 : index
    %80 = vector.load %arg1[%c7_47, %c0_48] : memref<8x256xf32, #tpu.memory_space<vmem>>, vector<1x256xf32>
    %81 = vector.broadcast %80 : vector<1x256xf32> to vector<48x256xf32>
    %82 = arith.mulf %79, %81 : vector<48x256xf32>
    %c384 = arith.constant 384 : index
    %c0_49 = arith.constant 0 : index
    %83 = vector.load %arg10[%c384, %c0_49] : memref<432x256xf32, #tpu.memory_space<vmem>>, vector<48x256xf32>
    tpu.vector_store %arg10[%c384, %c0_49], %82 {strides = array<i32>} : memref<432x256xf32, #tpu.memory_space<vmem>>, vector<48x256xf32>,
    %c0_50 = arith.constant 0 : index
    %c0_51 = arith.constant 0 : index
    %84 = vector.load %arg5[%c0_50, %c0_51] : memref<48x432xf32, #tpu.memory_space<vmem>>, vector<48x432xf32>
    %c0_52 = arith.constant 0 : index
    %c0_53 = arith.constant 0 : index
    %85 = vector.load %arg10[%c0_52, %c0_53] : memref<432x256xf32, #tpu.memory_space<vmem>>, vector<432x256xf32>
    %cst_54 = arith.constant dense<0.000000e+00> : vector<48x256xf32>
    %86 = tpu.matmul %84, %85, %cst_54 {dimension_numbers = #tpu.dot_dimension_numbers<[1], [0], [0], [1], [0, 0, 1, 1], [], []>} : vector<48x432xf32>, vector<432x256xf32>, vector<48x256xf32> -> vector<48x256xf32>
    %c0_55 = arith.constant 0 : index
    %c0_56 = arith.constant 0 : index
    %87 = vector.load %arg6[%c0_55, %c0_56] : memref<48x1xf32, #tpu.memory_space<vmem>>, vector<48x1xf32>
    %88 = vector.broadcast %87 : vector<48x1xf32> to vector<48x256xf32>
    %89 = arith.addf %86, %88 : vector<48x256xf32>
    %cst_57 = arith.constant 2.000000e-01 : f32
    %90 = vector.broadcast %cst_57 : f32 to vector<48x256xf32>
    %91 = arith.mulf %90, %89 : vector<48x256xf32>
    %92 = arith.maximumf %89, %91 : vector<48x256xf32>
    %c0_58 = arith.constant 0 : index
    %c0_59 = arith.constant 0 : index
    %93 = vector.load %arg7[%c0_58, %c0_59] : memref<4x48xf32, #tpu.memory_space<vmem>>, vector<4x48xf32>
    %cst_60 = arith.constant dense<0.000000e+00> : vector<4x256xf32>
    %94 = tpu.matmul %93, %92, %cst_60 {dimension_numbers = #tpu.dot_dimension_numbers<[1], [0], [0], [1], [0, 0, 1, 1], [], []>} : vector<4x48xf32>, vector<48x256xf32>, vector<4x256xf32> -> vector<4x256xf32>
    %c0_61 = arith.constant 0 : index
    %c0_62 = arith.constant 0 : index
    %95 = vector.load %arg8[%c0_61, %c0_62] : memref<4x1xf32, #tpu.memory_space<vmem>>, vector<4x1xf32>
    %96 = vector.broadcast %95 : vector<4x1xf32> to vector<4x256xf32>
    %97 = arith.addf %94, %96 : vector<4x256xf32>
    %c0_63 = arith.constant 0 : index
    %c0_64 = arith.constant 0 : index
    %c0_65 = arith.constant 0 : index
    %98 = vector.load %arg9[%c0_63, %c0_64, %c0_65] : memref<1x4x256xf32, #tpu.memory_space<vmem>>, vector<1x4x256xf32>
    %99 = vector.shape_cast %98 : vector<1x4x256xf32> to vector<4x256xf32>
    %100 = vector.shape_cast %97 : vector<4x256xf32> to vector<1x4x256xf32>
    tpu.vector_store %arg9[%c0_63, %c0_64, %c0_65], %100 {strides = array<i32>} : memref<1x4x256xf32, #tpu.memory_space<vmem>>, vector<1x4x256xf32>,
    return
  }
  func.func @transform_0(%arg0: i32) -> (i32, i32) {
    %c0_i32 = arith.constant 0 : i32
    %c0_i32_0 = arith.constant 0 : i32
    %c0_i32_1 = arith.constant 0 : i32
    return %c0_i32, %c0_i32_0 : i32, i32
  }
  func.func @transform_1(%arg0: i32) -> (i32, i32, i32) {
    %c0_i32 = arith.constant 0 : i32
    %c0_i32_0 = arith.constant 0 : i32
    %c0_i32_1 = arith.constant 0 : i32
    return %arg0, %c0_i32, %c0_i32_0 : i32, i32, i32
  }
  func.func @transform_2(%arg0: i32) -> (i32, i32) {
    %c0_i32 = arith.constant 0 : i32
    %c0_i32_0 = arith.constant 0 : i32
    %c0_i32_1 = arith.constant 0 : i32
    return %c0_i32, %c0_i32_0 : i32, i32
  }
  func.func @transform_3(%arg0: i32) -> (i32, i32) {
    %c0_i32 = arith.constant 0 : i32
    %c0_i32_0 = arith.constant 0 : i32
    %c0_i32_1 = arith.constant 0 : i32
    return %c0_i32, %c0_i32_0 : i32, i32
  }
  func.func @transform_4(%arg0: i32) -> (i32, i32) {
    %c0_i32 = arith.constant 0 : i32
    %c0_i32_0 = arith.constant 0 : i32
    %c0_i32_1 = arith.constant 0 : i32
    return %c0_i32, %c0_i32_0 : i32, i32
  }
  func.func @transform_5(%arg0: i32) -> (i32, i32) {
    %c0_i32 = arith.constant 0 : i32
    %c0_i32_0 = arith.constant 0 : i32
    %c0_i32_1 = arith.constant 0 : i32
    return %c0_i32, %c0_i32_0 : i32, i32
  }
  func.func @transform_6(%arg0: i32) -> (i32, i32) {
    %c0_i32 = arith.constant 0 : i32
    %c0_i32_0 = arith.constant 0 : i32
    %c0_i32_1 = arith.constant 0 : i32
    return %c0_i32, %c0_i32_0 : i32, i32
  }
  func.func @transform_7(%arg0: i32) -> (i32, i32) {
    %c0_i32 = arith.constant 0 : i32
    %c0_i32_0 = arith.constant 0 : i32
    %c0_i32_1 = arith.constant 0 : i32
    return %c0_i32, %c0_i32_0 : i32, i32
  }
  func.func @transform_8(%arg0: i32) -> (i32, i32, i32) {
    %c0_i32 = arith.constant 0 : i32
    %c0_i32_0 = arith.constant 0 : i32
    %c0_i32_1 = arith.constant 0 : i32
    return %arg0, %c0_i32, %c0_i32_0 : i32, i32, i32
  }
}

</mosaic_0001>

<bundles_post_ra>
// kernel: tpu_custom_call.1
= control target key start
LH: loop header
LB: loop body
LE: loop exit
PB: predicated region body
PF: predicated region fallthrough
CT: control target
= control target key end

     0   :  { %13 = vsyncpa [#allocation4], 0  ;;  %s3503_s0 = inlined_call_operand.vmem [shape: f32[8,256], index: 0, kind: input, shape index: {}]   ;;  %s3504_s1 = inlined_call_operand.vmem [shape: f32[2,8,256], index: 1, kind: input, shape index: {}]   ;;  %s3505_s2 = inlined_call_operand.vmem [shape: f32[48,72], index: 2, kind: input, shape index: {}]   ;;  %s3506_s3 = inlined_call_operand.vmem [shape: f32[48,1], index: 3, kind: input, shape index: {}]   ;;  %s3507_s4 = inlined_call_operand.hbm [shape: f32[48,432], index: 4, kind: input, shape index: {}]   ;;  %s3508_s5 = inlined_call_operand.vmem [shape: f32[48,1], index: 5, kind: input, shape index: {}]   ;;  %s3509_s6 = inlined_call_operand.vmem [shape: f32[4,48], index: 6, kind: input, shape index: {}]   ;;  %s3510_s7 = inlined_call_operand.vmem [shape: f32[4,1], index: 7, kind: input, shape index: {}]   ;;  %s3511_s8 = inlined_call_operand.hbm [shape: f32[2,4,256], index: 8, kind: output, shape index: {}]  }
   0x1   :  { %14 = vsyncpa [#allocation5], 0 }
   0x2   :  { %16 = vsyncpa [#allocation5 + $0x1], 0  ;;  %s2267_s27 = smov 0   ;;  %s2269_s28 = smov 0  }
   0x3   :  { %s2271_s29 = smov 0   ;;  %s2273_s30 = smov 0  }
   0x4 LB: > { %s2288_s9 = sadd.s32 4294967295, %s2206_s30   ;;  %s1845_s10 = sadd.s32 4294967294, %s2206_s30   ;;  %s2206_s30 = sphi %s2273_s30, %s3664_s30   ;;  %s2202_s29 = sphi %s2271_s29, %s3663_s29   ;;  %s2198_s28 = sphi %s2269_s28, %s3662_s28   ;;  %s2194_s27 = sphi %s2267_s27, %s3661_s27  }
   0x5   : > { %s2292_s11 = sadd.s32 1, %s2206_s30   ;;  %s202_s12 = sadd.s32 1, %s2202_s29 }
   0x6   : > { %s199_s13 = ssub.s32 %s2206_s30, %s2292_s11  ;;  %p212_p0 = scmp.ne.s32.totalorder %s2202_s29, %s2198_s28 }
   0x7   : > { %p200_p1 = scmp.eq.s32.totalorder %s199_s13, 0  ;;  %p213_p2 = scmp.eq.s32.totalorder %s2288_s9, 1 }
   0x8   : > { %p218_p3 = scmp.ne.s32.totalorder %s2198_s28, %s2194_s27  ;;  %p219_p4 = scmp.eq.s32.totalorder %s1845_s10, 1 }
   0x9   : > { %s2303_s14 = scalar_select %p200_p1, %s2202_s29, %s202_s12  }
   0xa   : > { %p2305_p5 = por %p213_p2, %p212_p0  ;;  %p2309_p6 = por %p219_p4, %p218_p3 }
   0xb   : > { %p1846_p7 = scmp.ge.s32.totalorder %s2206_s30, 1  ;;  %p226_p8 = scmp.lt.s32.totalorder %s2206_s30, 3 }
   0xc   : > { %s3560_s15 = scalar_select %p2305_p5, 1, 0 }
   0xd   : > { %s3561_s16 = scalar_select %p2309_p6, 1, 0 }
   0xe   : > { %p3512_p9 = scmp.eq.s32.totalorder %s2288_s9, 0  ;;  %p2316_p10 = pnand %p1846_p7, %p226_p8 }
   0xf   : > { %s2208_s18 = smov [#allocation3]   ;;  %s2112_s23 = scalar_lea.hbm %s3507_s4, 3072 }
  0x10   : > { %s3562_s17 = scalar_select %p2316_p10, 1, 0 }
  0x11   : > { %s247_s19 = sshll.u32 %s2208_s18, 4  ;;  %p2054_p11 = pneg %p2316_p10  ;;  %s248_s19 = int_to_ptr.vmem [resolvable:$true] %s247_s19 }
  0x12   : > { %p2113_p13 = scmp.ne.s32.totalorder %s3507_s4, %s2112_s23  ;;  %p2119_p3 = scmp.lt.u32.totalorder %s2112_s23, %s3507_s4 }
  0x13   : > { %p2324_p12 = pnand %p3512_p9, %p2054_p11 }
  0x15   : > { %p2114_p0 = pneg %p2324_p12 }
  0x17   : > { %p2115_p1 = pnand %p2114_p0, %p2113_p13 }
  0x19   : > { %p2116_p2 = pneg %p2115_p1 }
  0x1b   : > { %p2121_p4 = pnand %p2119_p3, %p2116_p2 }
  0x1d   : > { %2124 = shalt.err (!%p2121_p4)
}
  0x1e   : > { %s2125_s12 = scalar_lea.vmem %s248_s19, 3072  ;;  %p2133_p9 = scmp.lt.s32.totalorder %s248_s19, %s248_s19 }
  0x1f   : > { %p2126_p7 = scmp.ne.s32.totalorder %s248_s19, %s2125_s12  ;;  %p2134_p6 = scmp.lt.s32.totalorder %s2125_s12, %s2125_s12 }
  0x21   : > { %p2128_p8 = pnand %p2126_p7, %p2114_p0  ;;  %p2135_p5 = por %p2134_p6, %p2133_p9 }
  0x23   : > { %p2129_p11 = pneg %p2128_p8 }
  0x25   : > { %p2136_p10 = pnand %p2135_p5, %p2129_p11 }
  0x27   : > { %2139 = shalt.err (!%p2136_p10)
}
  0x28   : > { %s2209_s13 = smov 512   ;;  %s2210_s18 = smov 32  }
  0x29   : > { %2057 = dma.hbm_to_vmem [thread:$0]  (!%p2324_p12), %s3507_s4, 3072, %s248_s19, [#allocation4], %s2209_s13, %s2209_s13, %s2210_s18  }
  0x2a   : > { %p3564_p13 = scmp.ne.s32.totalorder %s3562_s17, 0 }
  0x2c   : > { %280 = sbr.rel (%p3564_p13) target bundleno = 1221 (0x4c5), region = 52 }
  0x33   : > { %p3565_p1 = scmp.eq.s32.totalorder %s2288_s9, 0 }
  0x35   : > { %2185 = dma.done.wait (%p3565_p1), [#allocation4], 3072   ;;  %p3566_p0 = pmov %p3565_p1 }
  0x36   : > { %p314_p5 = scmp.lt.s32.totalorder %s2288_s9, 1  ;;  %s2211_s19 = smov 16   ;;  %v3521_v2 = vmov 0.0   ;;  %v505_v3 = vld [vmem:[%s3506_s3 + $0x8] sm:$0xff]  ;;  %v504_v4 = vld [vmem:[%s3506_s3] sm:$0xff]  ;;  %v2220_v5 = vmov 0   ;;  %v325_v10 = vlaneseq }
  0x37   : > { %2187 = vsyncadd (%p3566_p0), [#allocation4], 4294964224  ;;  %s2212_s17 = smov 17   ;;  %s2213_s10 = smov 15   ;;  %623 = vmatprep.mubr.f32.mxu0 %v3521_v2  ;;  %2111 = vset.pattern.permute.xlu1 %v2220_v5  ;;  %v506_v6 = vld [vmem:[%s3506_s3 + $0x10] sm:$0xff]  ;;  %v507_v7 = vld [vmem:[%s3506_s3 + $0x18] sm:$0xff] }
  0x38   : > { %s315_s23 = scalar_select %p314_p5, %s2288_s9, 1  ;;  %2110 = vset.pattern.permute.xlu0 %v2220_v5  ;;  %v508_v8 = vld [vmem:[%s3506_s3 + $0x20] sm:$0xff]  ;;  %v509_v9 = vld [vmem:[%s3506_s3 + $0x28] sm:$0xff]  ;;  %v333_v11 = vshrl.u32 %v325_v10, 7  ;;  %v2410_v12 = vand.u32 127, %v325_v10  ;;  %vm540_vm8 = vcmask 588800  }
  0x39   : > { %s3519_s12 = smov 1   ;;  %s3515_s13 = smov 127   ;;  %v330_v15 = vld [vmem:[%s3503_s0] ss:$8 sm:$0x3]  ;;  %vm1428_vm9 = vcmask 392192  }
  0x3a   : > { %s1886_s24 = sshll.u32 %s315_s23, 4  ;;  %s2216_s18 = smov 113   ;;  %v2412_v13 = vsub.s32 0, %v333_v11  ;;  %v2414_v14 = vsub.s32 1, %v333_v11  ;;  %vm348_vm0 = vcmp.lt.s32.totalorder %v2410_v12, 16  ;;  %vm327_vm1 = vcmp.lt.s32.totalorder %v2410_v12, 17 }
  0x3b   : > { %s318_s26 = scalar_lea.vmem %s3504_s1, %s1886_s24  ;;  %s3517_s21 = smov 112   ;;  %v1854_v16 = vld [vmem:[%s3503_s0 + $0x1] ss:$8 sm:$0x3]  ;;  %vm370_vm2 = vcmp.lt.s32.totalorder %v2410_v12, 15  ;;  %vm392_vm3 = vcmp.lt.s32.totalorder %v2410_v12, 1 }
  0x3c   : > { %v2355_v0 = vld [vmem:[%s318_s26] sm:$0xff]  ;;  %v2361_v1 = vld [vmem:[%s318_s26 + $0x8] sm:$0xff]  ;;  %s2219_s22 = smov 111   ;;  %3567 = vst [vmem:[#allocation9_spill] sm:$0xff] %v2412_v13  ;;  %3568 = vst [vmem:[#allocation10_spill] sm:$0xff] %v2414_v14  ;;  %v2425_v19 = vrot.slane %v330_v15, %v2414_v14  ;;  %v361_v20 = vrot.slane %v1854_v16, %v2414_v14  ;;  %v2429_v21 = vrot.slane %v330_v15, %v2412_v13  ;;  %vm414_vm4 = vcmp.lt.s32.totalorder %v2410_v12, 127 }
  0x3d   : > { %344 = vrot.lane.b32.xlu1 %v2355_v0, %s2211_s19  ;;  %321 = vrot.lane.b32.xlu0 %v2355_v0, %s2212_s17  ;;  %v357_v22 = vrot.slane %v1854_v16, %v2412_v13  ;;  %v1855_v33 = vld [vmem:[%s3503_s0 + $0x2] ss:$8 sm:$0x3]  ;;  %v1856_v34 = vld [vmem:[%s3503_s0 + $0x3] ss:$8 sm:$0x3] }
  0x3e   : > { %v379_v39 = vrot.slane %v1855_v33, %v2412_v13  ;;  %v383_v40 = vrot.slane %v1855_v33, %v2414_v14  ;;  %v401_v41 = vrot.slane %v1856_v34, %v2412_v13  ;;  %v405_v42 = vrot.slane %v1856_v34, %v2414_v14  ;;  %v1857_v43 = vld [vmem:[%s3503_s0 + $0x4] ss:$8 sm:$0x3]  ;;  %v1860_v16 = vld [vmem:[%s3503_s0 + $0x7] ss:$8 sm:$0x3] }
  0x3f   : > { %v423_v50 = vrot.slane %v1857_v43, %v2412_v13  ;;  %v427_v51 = vrot.slane %v1857_v43, %v2414_v14  ;;  %vm436_vm5 = vcmp.lt.s32.totalorder %v2410_v12, 113  ;;  %vm458_vm6 = vcmp.lt.s32.totalorder %v2410_v12, 112  ;;  %s3571_s23 = smov 1   ;;  %s3572_s24 = smov 112  }
  0x40   : > { %vm480_vm7 = vcmp.lt.s32.totalorder %v2410_v12, 111  ;;  %s3577_s25 = smov 127   ;;  %v1262_v12 = vld [vmem:[#allocation3 + $0x10] sm:$0xff]  ;;  %p3659_p9 = scmp.ne.s32.totalorder %s3560_s15, 0 }
  0x41   : > { %346 = vrot.lane.b32.xlu1 %v2361_v1, %s2211_s19  ;;  %323 = vrot.lane.b32.xlu0 %v2361_v1, %s2212_s17 }
  0x45   : > { %368 = vrot.lane.b32.xlu1 %v2361_v1, %s2213_s10  ;;  %366 = vrot.lane.b32.xlu0 %v2355_v0, %s2213_s10 }
  0x49   : > { %390 = vrot.lane.b32.xlu1 %v2361_v1, %s3519_s12  ;;  %388 = vrot.lane.b32.xlu0 %v2355_v0, %s3519_s12 }
  0x4d   : > { %412 = vrot.lane.b32.xlu1 %v2361_v1, %s3515_s13  ;;  %410 = vrot.lane.b32.xlu0 %v2355_v0, %s3515_s13 }
  0x51   : > { %434 = vrot.lane.b32.xlu1 %v2361_v1, %s2216_s18  ;;  %432 = vrot.lane.b32.xlu0 %v2355_v0, %s2216_s18 }
  0x55   : > { %456 = vrot.lane.b32.xlu1 %v2361_v1, %s3517_s21  ;;  %454 = vrot.lane.b32.xlu0 %v2355_v0, %s3517_s21  ;;  %s311_s21 = sand.u32 1, %s2198_s28  }
  0x56   : > { %s1851_s26 = sshll.u32 %s311_s21, 3 }
  0x57   : > { %s313_s20 = scalar_lea.vmem [#allocation6], %s1851_s26 }
  0x58   : > { %s1774_s12 = sshll.u32 %s313_s20, 4  ;;  %s3463_s12 = int_to_ptr.vmem [resolvable:$true] %s1774_s12 }
  0x59   : > { %478 = vrot.lane.b32.xlu1 %v2361_v1, %s2219_s22  ;;  %476 = vrot.lane.b32.xlu0 %v2355_v0, %s2219_s22 }
  0x5d   : > { %517 = vperm.xlu1 %2111, %v505_v3   ;;  %512 = vperm.xlu0 %2110, %v504_v4   ;;  %v1858_v3 = vld [vmem:[%s3503_s0 + $0x5] ss:$8 sm:$0x3]  ;;  %v1859_v4 = vld [vmem:[%s3503_s0 + $0x6] ss:$8 sm:$0x3] }
  0x5e   : > { %v449_v10 = vrot.slane %v1858_v3, %v2414_v14  ;;  %v467_v11 = vrot.slane %v1859_v4, %v2412_v13  ;;  %v471_v15 = vrot.slane %v1859_v4, %v2414_v14 }
  0x61   : > { %522 = vperm.xlu1 %2111, %v506_v6   ;;  %527 = vperm.xlu0 %2110, %v507_v7  }
  0x65   : > { %532 = vperm.xlu1 %2111, %v508_v8   ;;  %537 = vperm.xlu0 %2110, %v509_v9   ;;  %v445_v9 = vrot.slane %v1858_v3, %v2412_v13 }
  0xaf   : > { %v345_v17 = vpop.permute.xlu1 %344  ;;  %v322_v18 = vpop.permute.xlu0 %321 }
  0xb3   : > { %v347_v23 = vpop.permute.xlu1 %346  ;;  %v324_v24 = vpop.permute.xlu0 %323 }
  0xb4   : > { %v350_v25 = vsel %vm348_vm0, %v347_v23, %v345_v17  ;;  %v329_v26 = vsel %vm327_vm1, %v324_v24, %v322_v18  ;;  %v328_v27 = vsel %vm327_vm1, %v322_v18, %v324_v24  ;;  %v349_v28 = vsel %vm348_vm0, %v345_v17, %v347_v23 }
  0xb5   : > { %v343_v29 = vmul.f32 %v2425_v19, %v328_v27  ;;  %v365_v30 = vmul.f32 %v361_v20, %v349_v28  ;;  %v342_v31 = vmul.f32 %v2429_v21, %v329_v26  ;;  %v364_v32 = vmul.f32 %v357_v22, %v350_v25 }
  0xb6   : > { %v493_v23 = vrot.slane %v1860_v16, %v2414_v14  ;;  %v489_v28 = vrot.slane %v1860_v16, %v2412_v13 }
  0xb7   : > { %v369_v35 = vpop.permute.xlu1 %368  ;;  %v367_v36 = vpop.permute.xlu0 %366  ;;  %v1888_v37 = vpack.c.bf16 %v365_v30, %v343_v29  ;;  %v1890_v38 = vpack.c.bf16 %v364_v32, %v342_v31 }
  0xb8   : > { %v371_v44 = vsel %vm370_vm2, %v367_v36, %v369_v35  ;;  %v372_v45 = vsel %vm370_vm2, %v369_v35, %v367_v36 }
  0xb9   : > { %1889 = vmatprep.subr.bf16.mxu0 %v1888_v37  ;;  %v386_v52 = vmul.f32 %v379_v39, %v372_v45  ;;  %v387_v53 = vmul.f32 %v383_v40, %v371_v44  ;;  %v498_v37 = vld [vmem:[%s3505_s2] sm:$0xff]  ;;  %v500_v39 = vld [vmem:[%s3505_s2 + $0x10] sm:$0xff]  ;;  %v501_v40 = vld [vmem:[%s3505_s2 + $0x18] sm:$0xff] }
  0xba   : > { %1891 = vmatpush1.bf16.msra.mxu0 %v1890_v38  ;;  %v499_v38 = vld [vmem:[%s3505_s2 + $0x8] sm:$0xff] }
  0xbb   : > { %v391_v46 = vpop.permute.xlu1 %390  ;;  %v389_v47 = vpop.permute.xlu0 %388 }
  0xbc   : > { %v393_v48 = vsel %vm392_vm3, %v389_v47, %v391_v46  ;;  %v394_v49 = vsel %vm392_vm3, %v391_v46, %v389_v47 }
  0xbd   : > { %v408_v54 = vmul.f32 %v401_v41, %v394_v49  ;;  %v409_v55 = vmul.f32 %v405_v42, %v393_v48  ;;  %v502_v41 = vld [vmem:[%s3505_s2 + $0x20] sm:$0xff]  ;;  %v503_v42 = vld [vmem:[%s3505_s2 + $0x28] sm:$0xff] }
  0xbf   : > { %v413_v56 = vpop.permute.xlu1 %412  ;;  %v411_v57 = vpop.permute.xlu0 %410  ;;  %v1892_v58 = vpack.c.bf16 %v409_v55, %v387_v53  ;;  %v1894_v59 = vpack.c.bf16 %v408_v54, %v386_v52 }
  0xc0   : > { %v415_v60 = vsel %vm414_vm4, %v411_v57, %v413_v56  ;;  %v416_v61 = vsel %vm414_vm4, %v413_v56, %v411_v57 }
  0xc1   : > { %v430_v62 = vmul.f32 %v423_v50, %v415_v60  ;;  %v431_v63 = vmul.f32 %v427_v51, %v416_v61  ;;  %1893 = vmatprep.subr.bf16.mxu0 %v1892_v58 }
  0xc2   : > { %1895 = vmatpush1.bf16.msra.mxu0 %v1894_v59 }
  0xc3   : > { %v435_v5 = vpop.permute.xlu1 %434  ;;  %v433_v6 = vpop.permute.xlu0 %432  ;;  %v1896_v7 = vpack.c.bf16 %v431_v63, %v2361_v1  ;;  %v1898_v8 = vpack.c.bf16 %v430_v62, %v2355_v0 }
  0xc4   : > { %v437_v1 = vsel %vm436_vm5, %v433_v6, %v435_v5  ;;  %v438_v0 = vsel %vm436_vm5, %v435_v5, %v433_v6 }
  0xc5   : > { %1897 = vmatprep.subr.bf16.mxu0 %v1896_v7  ;;  %v452_v24 = vmul.f32 %v445_v9, %v437_v1  ;;  %v453_v25 = vmul.f32 %v449_v10, %v438_v0 }
  0xc6   : > { %1899 = vmatpush1.bf16.msra.mxu0 %v1898_v8 }
  0xc7   : > { %v457_v17 = vpop.permute.xlu1 %456  ;;  %v455_v18 = vpop.permute.xlu0 %454 }
  0xc8   : > { %v459_v20 = vsel %vm458_vm6, %v455_v18, %v457_v17  ;;  %v460_v22 = vsel %vm458_vm6, %v457_v17, %v455_v18 }
  0xc9   : > { %v474_v26 = vmul.f32 %v467_v11, %v459_v20  ;;  %v475_v27 = vmul.f32 %v471_v15, %v460_v22 }
  0xcb   : > { %v479_v29 = vpop.permute.xlu1 %478  ;;  %v1900_v30 = vpack.c.bf16 %v475_v27, %v453_v25  ;;  %v477_v31 = vpop.permute.xlu0 %476  ;;  %v1902_v32 = vpack.c.bf16 %v474_v26, %v452_v24 }
  0xcc   : > { %v481_v33 = vsel %vm480_vm7, %v477_v31, %v479_v29  ;;  %v482_v34 = vsel %vm480_vm7, %v479_v29, %v477_v31 }
  0xcd   : > { %1901 = vmatprep.subr.bf16.mxu0 %v1900_v30  ;;  %v497_v35 = vmul.f32 %v493_v23, %v482_v34  ;;  %v496_v36 = vmul.f32 %v489_v28, %v481_v33 }
  0xce   : > { %1903 = vmatpush1.bf16.msra.mxu0 %v1902_v32 }
  0xcf   : > { %575 = vmatprep.subr.mxu0 %v497_v35 }
  0xd2   : > { %576 = vmatpush1.msra.mxu0 %v496_v36 }
  0xd3   : > { %1861 = vmatmul.mubr.msk.f32.vlgmr.msra.gmra.mrb[0].mxu0 %vm540_vm8, %v498_v37 }
  0xd4   : > { %629 = vmatprep.mubr.f32.mxu0 %v3521_v2 }
  0xd7   : > { %1862 = vmatmul.mubr.msk.f32.gmra.mrb[2].mxu0 %vm540_vm8, %v499_v38 }
  0xd8   : > { %635 = vmatprep.mubr.f32.mxu0 %v3521_v2 }
  0xdb   : > { %1863 = vmatmul.mubr.msk.f32.gmra.mrb[4].mxu0 %vm540_vm8, %v500_v39 }
  0xdc   : > { %641 = vmatprep.mubr.f32.mxu0 %v3521_v2  ;;  %v513_v43 = vpop.permute.xlu0 %512  ;;  %v518_v48 = vpop.permute.xlu1 %517 }
  0xdf   : > { %1864 = vmatmul.mubr.msk.f32.gmra.mrb[6].mxu0 %vm540_vm8, %v501_v40 }
  0xe0   : > { %647 = vmatprep.mubr.f32.mxu0 %v3521_v2  ;;  %v523_v8 = vpop.permute.xlu1 %522  ;;  %v528_v10 = vpop.permute.xlu0 %527 }
  0xe3   : > { %1865 = vmatmul.mubr.msk.f32.gmra.mrb[8].mxu0 %vm540_vm8, %v502_v41 }
  0xe4   : > { %653 = vmatprep.mubr.f32.mxu0 %v3521_v2  ;;  %v533_v25 = vpop.permute.xlu1 %532  ;;  %v538_v27 = vpop.permute.xlu0 %537 }
  0xe7   : > { %1866 = vmatmul.mubr.msk.f32.gmra.mrb[10].mxu0 %vm540_vm8, %v503_v42 }
 0x1a6   : > { %v625_v44 = vpop.f32.mrb[0].mxu0 }
 0x1a7   : > { %v626_v45 = vadd.f32 %v625_v44, %v513_v43  ;;  %v627_v46 = vpop.f32.mrb[1].mxu0 }
 0x1a8   : > { %v628_v62 = vadd.f32 %v627_v46, %v513_v43 }
 0x1a9   : > { %v660_v47 = vmul.f32 0.2, %v626_v45 }
 0x1aa   : > { %v631_v49 = vpop.f32.mrb[2].mxu0  ;;  %v661_v3 = vmul.f32 0.2, %v628_v62 }
 0x1ab   : > { %v2533_v50 = vmax.f32 %v626_v45, %v660_v47  ;;  %v632_v51 = vadd.f32 %v631_v49, %v518_v48  ;;  %v633_v52 = vpop.f32.mrb[3].mxu0 }
 0x1ac   : > { %v634_v4 = vadd.f32 %v633_v52, %v518_v48  ;;  %v2567_v5 = vmax.f32 %v628_v62, %v661_v3  ;;  %v1868_v62 = vld [vmem:[%s3503_s0 + $0x2] ss:$8 sm:$0x3] }
 0x1ad   : > { %3569 = vst [vmem:[#allocation11_spill] sm:$0xff] %v2533_v50  ;;  %v662_v53 = vmul.f32 0.2, %v632_v51  ;;  %684 = vrot.lane.b32.xlu1 %v2533_v50, %s2212_s17 }
 0x1ae   : > { %v637_v54 = vpop.f32.mrb[4].mxu0  ;;  %3573 = vst [vmem:[#allocation13_spill] sm:$0xff] %v2567_v5  ;;  %v663_v6 = vmul.f32 0.2, %v634_v4 }
 0x1af   : > { %v2537_v55 = vmax.f32 %v632_v51, %v662_v53  ;;  %v639_v56 = vpop.f32.mrb[5].mxu0  ;;  %v638_v9 = vadd.f32 %v637_v54, %v523_v8  ;;  %v1867_v53 = vld [vmem:[%s3503_s0 + $0x1] ss:$8 sm:$0x3] }
 0x1b0   : > { %v2573_v7 = vmax.f32 %v634_v4, %v663_v6  ;;  %v640_v17 = vadd.f32 %v639_v56, %v523_v8  ;;  %v2729_v54 = vrot.slane %v1867_v53, %v2412_v13 }
 0x1b1   : > { %3570 = vst [vmem:[#allocation12_spill] sm:$0xff] %v2537_v55  ;;  %686 = vrot.lane.b32.xlu0 %v2537_v55, %s2212_s17  ;;  %744 = vrot.lane.b32.xlu1 %v2533_v50, %s2211_s19  ;;  %v664_v11 = vmul.f32 0.2, %v638_v9 }
 0x1b2   : > { %v643_v57 = vpop.f32.mrb[6].mxu0  ;;  %3574 = vst [vmem:[#allocation14_spill] sm:$0xff] %v2573_v7  ;;  %v665_v18 = vmul.f32 0.2, %v640_v17 }
 0x1b3   : > { %v645_v58 = vpop.f32.mrb[7].mxu0  ;;  %v644_v15 = vadd.f32 %v643_v57, %v528_v10  ;;  %v2595_v16 = vmax.f32 %v638_v9, %v664_v11  ;;  %v2760_v11 = vrot.slane %v1868_v62, %v2414_v14 }
 0x1b4   : > { %v646_v20 = vadd.f32 %v645_v58, %v528_v10  ;;  %v2627_v22 = vmax.f32 %v640_v17, %v665_v18  ;;  %v2757_v10 = vrot.slane %v1868_v62, %v2412_v13 }
 0x1b5   : > { %746 = vrot.lane.b32.xlu0 %v2537_v55, %s2211_s19  ;;  %816 = vrot.lane.b32.xlu1 %v2533_v50, %s2213_s10  ;;  %3575 = vst [vmem:[#allocation15_spill] sm:$0xff] %v2595_v16  ;;  %v666_v1 = vmul.f32 0.2, %v644_v15 }
 0x1b6   : > { %v2547_v59 = vpop.f32.mrb[8].mxu0  ;;  %3578 = vst [vmem:[#allocation17_spill] sm:$0xff] %v2627_v22  ;;  %v667_v23 = vmul.f32 0.2, %v646_v20 }
 0x1b7   : > { %v2549_v60 = vpop.f32.mrb[9].mxu0  ;;  %v2601_v0 = vmax.f32 %v644_v15, %v666_v1  ;;  %v650_v26 = vadd.f32 %v2547_v59, %v533_v25  ;;  %v2734_v59 = vrot.slane %v1867_v53, %v2414_v14 }
 0x1b8   : > { %v2633_v24 = vmax.f32 %v646_v20, %v667_v23  ;;  %v652_v36 = vadd.f32 %v2549_v60, %v533_v25  ;;  %v1871_v25 = vld [vmem:[%s3503_s0 + $0x5] ss:$8 sm:$0x3] }
 0x1b9   : > { %818 = vrot.lane.b32.xlu0 %v2537_v55, %s2213_s10  ;;  %1044 = vrot.lane.b32.xlu1 %v2533_v50, %s2216_s18  ;;  %3576 = vst [vmem:[#allocation16_spill] sm:$0xff] %v2601_v0  ;;  %v668_v28 = vmul.f32 0.2, %v650_v26 }
 0x1ba   : > { %v2555_v61 = vpop.f32.mrb[10].mxu0  ;;  %3579 = vst [vmem:[#allocation18_spill] sm:$0xff] %v2633_v24  ;;  %v669_v39 = vmul.f32 0.2, %v652_v36 }
 0x1bb   : > { %v2557_v63 = vpop.f32.mrb[11].mxu0  ;;  %v656_v29 = vadd.f32 %v2555_v61, %v538_v27  ;;  %v2661_v30 = vmax.f32 %v650_v26, %v668_v28 }
 0x1bc   : > { %v658_v40 = vadd.f32 %v2557_v63, %v538_v27  ;;  %v2699_v43 = vmax.f32 %v652_v36, %v669_v39  ;;  %v2794_v36 = vrot.slane %v1871_v25, %v2414_v14 }
 0x1bd   : > { %1046 = vrot.lane.b32.xlu0 %v2537_v55, %s2216_s18  ;;  %888 = vrot.lane.b32.xlu1 %v2533_v50, %s3571_s23  ;;  %3580 = vst [vmem:[#allocation19_spill] sm:$0xff] %v2661_v30  ;;  %v670_v31 = vmul.f32 0.2, %v656_v29 }
 0x1be   : > { %3582 = vst [vmem:[#allocation21_spill] sm:$0xff] %v2699_v43  ;;  %v671_v44 = vmul.f32 0.2, %v658_v40 }
 0x1bf   : > { %v2667_v32 = vmax.f32 %v656_v29, %v670_v31 }
 0x1c0   : > { %v2709_v47 = vmax.f32 %v658_v40, %v671_v44  ;;  %v1392_v40 = vld [vmem:[%s3508_s5] sm:$0xff] }
 0x1c1   : > { %890 = vrot.lane.b32.xlu0 %v2537_v55, %s3571_s23  ;;  %1116 = vrot.lane.b32.xlu1 %v2533_v50, %s3572_s24  ;;  %3581 = vst [vmem:[#allocation20_spill] sm:$0xff] %v2667_v32 }
 0x1c2   : > { %3583 = vst [vmem:[#allocation22_spill] sm:$0xff] %v2709_v47 }
 0x1c5   : > { %1118 = vrot.lane.b32.xlu0 %v2537_v55, %s3572_s24  ;;  %696 = vrot.lane.b32.xlu1 %v2567_v5, %s2212_s17 }
 0x1c9   : > { %698 = vrot.lane.b32.xlu0 %v2573_v7, %s2212_s17  ;;  %756 = vrot.lane.b32.xlu1 %v2567_v5, %s2211_s19 }
 0x1cd   : > { %758 = vrot.lane.b32.xlu0 %v2573_v7, %s2211_s19  ;;  %828 = vrot.lane.b32.xlu1 %v2567_v5, %s2213_s10 }
 0x1d1   : > { %830 = vrot.lane.b32.xlu0 %v2573_v7, %s2213_s10  ;;  %1056 = vrot.lane.b32.xlu1 %v2567_v5, %s2216_s18 }
 0x1d5   : > { %1058 = vrot.lane.b32.xlu0 %v2573_v7, %s2216_s18  ;;  %900 = vrot.lane.b32.xlu1 %v2567_v5, %s3571_s23 }
 0x1d9   : > { %902 = vrot.lane.b32.xlu0 %v2573_v7, %s3571_s23  ;;  %1128 = vrot.lane.b32.xlu1 %v2567_v5, %s3572_s24 }
 0x1dd   : > { %1130 = vrot.lane.b32.xlu0 %v2573_v7, %s3572_s24  ;;  %688 = vrot.lane.b32.xlu1 %v2595_v16, %s2212_s17 }
 0x1e1   : > { %748 = vrot.lane.b32.xlu1 %v2595_v16, %s2211_s19  ;;  %690 = vrot.lane.b32.xlu0 %v2601_v0, %s2212_s17 }
 0x1e5   : > { %976 = vrot.lane.b32.xlu1 %v2595_v16, %s3577_s25  ;;  %750 = vrot.lane.b32.xlu0 %v2601_v0, %s2211_s19 }
 0x1e9   : > { %820 = vrot.lane.b32.xlu1 %v2595_v16, %s2213_s10  ;;  %978 = vrot.lane.b32.xlu0 %v2601_v0, %s3577_s25 }
 0x1ed   : > { %1048 = vrot.lane.b32.xlu1 %v2595_v16, %s2216_s18  ;;  %822 = vrot.lane.b32.xlu0 %v2601_v0, %s2213_s10 }
 0x1f1   : > { %892 = vrot.lane.b32.xlu1 %v2595_v16, %s3571_s23  ;;  %1050 = vrot.lane.b32.xlu0 %v2601_v0, %s2216_s18 }
 0x1f5   : > { %1120 = vrot.lane.b32.xlu1 %v2595_v16, %s3572_s24  ;;  %894 = vrot.lane.b32.xlu0 %v2601_v0, %s3571_s23 }
 0x1f9   : > { %700 = vrot.lane.b32.xlu1 %v2627_v22, %s2212_s17  ;;  %1122 = vrot.lane.b32.xlu0 %v2601_v0, %s3572_s24 }
 0x1fd   : > { %760 = vrot.lane.b32.xlu1 %v2627_v22, %s2211_s19  ;;  %702 = vrot.lane.b32.xlu0 %v2633_v24, %s2212_s17 }
 0x201   : > { %988 = vrot.lane.b32.xlu1 %v2627_v22, %s3577_s25  ;;  %762 = vrot.lane.b32.xlu0 %v2633_v24, %s2211_s19 }
 0x205   : > { %832 = vrot.lane.b32.xlu1 %v2627_v22, %s2213_s10  ;;  %990 = vrot.lane.b32.xlu0 %v2633_v24, %s3577_s25 }
 0x209   : > { %1060 = vrot.lane.b32.xlu1 %v2627_v22, %s2216_s18  ;;  %834 = vrot.lane.b32.xlu0 %v2633_v24, %s2213_s10 }
 0x20d   : > { %904 = vrot.lane.b32.xlu1 %v2627_v22, %s3571_s23  ;;  %1062 = vrot.lane.b32.xlu0 %v2633_v24, %s2216_s18 }
 0x211   : > { %1132 = vrot.lane.b32.xlu1 %v2627_v22, %s3572_s24  ;;  %906 = vrot.lane.b32.xlu0 %v2633_v24, %s3571_s23 }
 0x215   : > { %692 = vrot.lane.b32.xlu1 %v2661_v30, %s2212_s17  ;;  %1134 = vrot.lane.b32.xlu0 %v2633_v24, %s3572_s24 }
 0x219   : > { %752 = vrot.lane.b32.xlu1 %v2661_v30, %s2211_s19  ;;  %694 = vrot.lane.b32.xlu0 %v2667_v32, %s2212_s17 }
 0x21d   : > { %980 = vrot.lane.b32.xlu1 %v2661_v30, %s3577_s25  ;;  %754 = vrot.lane.b32.xlu0 %v2667_v32, %s2211_s19 }
 0x21f   : > { %v685_v33 = vpop.permute.xlu1 %684 }
 0x221   : > { %824 = vrot.lane.b32.xlu1 %v2661_v30, %s2213_s10  ;;  %982 = vrot.lane.b32.xlu0 %v2667_v32, %s3577_s25 }
 0x223   : > { %v745_v34 = vpop.permute.xlu1 %744  ;;  %v687_v35 = vpop.permute.xlu0 %686 }
 0x225   : > { %1052 = vrot.lane.b32.xlu1 %v2661_v30, %s2216_s18  ;;  %826 = vrot.lane.b32.xlu0 %v2667_v32, %s2213_s10 }
 0x227   : > { %v817_v37 = vpop.permute.xlu1 %816  ;;  %v747_v38 = vpop.permute.xlu0 %746 }
 0x229   : > { %896 = vrot.lane.b32.xlu1 %v2661_v30, %s3571_s23  ;;  %1054 = vrot.lane.b32.xlu0 %v2667_v32, %s2216_s18 }
 0x22b   : > { %v2691_v41 = vpop.permute.xlu1 %1044  ;;  %v2693_v42 = vpop.permute.xlu0 %818 }
 0x22d   : > { %1124 = vrot.lane.b32.xlu1 %v2661_v30, %s3572_s24  ;;  %898 = vrot.lane.b32.xlu0 %v2667_v32, %s3571_s23 }
 0x22f   : > { %v2701_v45 = vpop.permute.xlu1 %888  ;;  %v2703_v46 = vpop.permute.xlu0 %1046 }
 0x231   : > { %704 = vrot.lane.b32.xlu1 %v2699_v43, %s2212_s17  ;;  %1126 = vrot.lane.b32.xlu0 %v2667_v32, %s3572_s24 }
 0x233   : > { %v2711_v48 = vpop.permute.xlu1 %1116  ;;  %v2713_v49 = vpop.permute.xlu0 %890 }
 0x235   : > { %1188 = vrot.lane.b32.xlu1 %v2533_v50, %s2219_s22  ;;  %706 = vrot.lane.b32.xlu0 %v2709_v47, %s2212_s17 }
 0x237   : > { %v697_v51 = vpop.permute.xlu1 %696  ;;  %v2719_v52 = vpop.permute.xlu0 %1118 }
 0x238   : > { %v714_v58 = vsel %vm327_vm1, %v697_v51, %v685_v33  ;;  %v708_v63 = vsel %vm327_vm1, %v685_v33, %v697_v51 }
 0x239   : > { %764 = vrot.lane.b32.xlu1 %v2699_v43, %s2211_s19  ;;  %1190 = vrot.lane.b32.xlu0 %v2537_v55, %s2219_s22  ;;  %v720_v9 = vmul.f32 %v714_v58, %v2429_v21  ;;  %v721_v23 = vmul.f32 %v708_v63, %v2425_v19 }
 0x23b   : > { %v757_v56 = vpop.permute.xlu1 %756  ;;  %v699_v57 = vpop.permute.xlu0 %698 }
 0x23c   : > { %v709_v60 = vsel %vm327_vm1, %v687_v35, %v699_v57  ;;  %v715_v61 = vsel %vm327_vm1, %v699_v57, %v687_v35  ;;  %v774_v3 = vsel %vm348_vm0, %v757_v56, %v745_v34  ;;  %v768_v6 = vsel %vm348_vm0, %v745_v34, %v757_v56  ;;  %v1869_v57 = vld [vmem:[%s3503_s0 + $0x3] ss:$8 sm:$0x3] }
 0x23d   : > { %v722_v4 = vmul.f32 %v715_v61, %v2429_v21  ;;  %992 = vrot.lane.b32.xlu1 %v2699_v43, %s3577_s25  ;;  %1202 = vrot.lane.b32.xlu0 %v2573_v7, %s2219_s22  ;;  %v723_v8 = vmul.f32 %v709_v60, %v2425_v19  ;;  %v2763_v17 = vmul.f32 %v2729_v54, %v774_v3 }
 0x23e   : > { %v2774_v26 = vmul.f32 %v2734_v59, %v768_v6  ;;  %v2791_v35 = vrot.slane %v1871_v25, %v2412_v13  ;;  %v2835_v62 = vrot.slane %v1869_v57, %v2414_v14 }
 0x23f   : > { %v829_v15 = vpop.permute.xlu1 %828  ;;  %v759_v1 = vpop.permute.xlu0 %758  ;;  %v1906_v29 = vpack.c.bf16 %v722_v4, %v720_v9  ;;  %v1904_v34 = vpack.c.bf16 %v723_v8, %v721_v23  ;;  %v1263_v4 = vld [vmem:[#allocation3 + $0x18] sm:$0xff] }
 0x240   : > { %v769_v18 = vsel %vm348_vm0, %v747_v38, %v759_v1  ;;  %v775_v20 = vsel %vm348_vm0, %v759_v1, %v747_v38  ;;  %v840_v31 = vsel %vm370_vm2, %v817_v37, %v829_v15  ;;  %v846_v33 = vsel %vm370_vm2, %v829_v15, %v817_v37  ;;  %3585 = vst [vmem:[#allocation24_spill] sm:$0xff] %v2835_v62 }
 0x241   : > { %v2777_v27 = vmul.f32 %v2729_v54, %v775_v20  ;;  %v2780_v28 = vmul.f32 %v2734_v59, %v769_v18  ;;  %836 = vrot.lane.b32.xlu1 %v2699_v43, %s2213_s10  ;;  %766 = vrot.lane.b32.xlu0 %v2709_v47, %s2211_s19  ;;  %v2816_v58 = vmul.f32 %v2757_v10, %v846_v33  ;;  %v1872_v18 = vld [vmem:[%s3503_s0 + $0x6] ss:$8 sm:$0x3]  ;;  %s1887_s19 = sshll.u32 %s2288_s9, 7  ;;  %s2221_s9 = smov [#allocation6]  }
 0x242   : > { %1905 = vmatprep.subr.bf16.mxu1 %v1904_v34  ;;  %v2819_v60 = vmul.f32 %v2760_v11, %v840_v31  ;;  %v2878_v31 = vrot.slane %v1872_v18, %v2414_v14  ;;  %1874 = vmatprep.mubr.msk.f32.mxu0 %vm1428_vm9, %v1263_v4 }
 0x243   : > { %v1057_v38 = vpop.permute.xlu1 %1056  ;;  %v831_v39 = vpop.permute.xlu0 %830  ;;  %1907 = vmatpush1.bf16.msra.mxu1 %v1906_v29  ;;  %v2875_v29 = vrot.slane %v1872_v18, %v2412_v13 }
 0x244   : > { %v1068_v37 = vsel %vm436_vm5, %v2691_v41, %v1057_v38  ;;  %v1074_v51 = vsel %vm436_vm5, %v1057_v38, %v2691_v41  ;;  %v841_v53 = vsel %vm370_vm2, %v2693_v42, %v831_v39  ;;  %v847_v56 = vsel %vm370_vm2, %v831_v39, %v2693_v42  ;;  %3587 = vst [vmem:[#allocation26_spill] sm:$0xff] %v2878_v31 }
 0x245   : > { %v2822_v41 = vmul.f32 %v2757_v10, %v847_v56  ;;  %v2825_v61 = vmul.f32 %v2760_v11, %v841_v53  ;;  %1064 = vrot.lane.b32.xlu1 %v2699_v43, %s2216_s18  ;;  %1194 = vrot.lane.b32.xlu0 %v2601_v0, %s2219_s22  ;;  %v2832_v42 = vrot.slane %v1869_v57, %v2412_v13 }
 0x246   : > { %v2857_v20 = vmul.f32 %v2791_v35, %v1068_v37  ;;  %v2860_v23 = vmul.f32 %v2794_v36, %v1074_v51  ;;  %3586 = vst [vmem:[#allocation25_spill] sm:$0xff] %v2875_v29 }
 0x247   : > { %3584 = vst [vmem:[#allocation23_spill] sm:$0xff] %v2832_v42  ;;  %v901_v63 = vpop.permute.xlu1 %900  ;;  %v1059_v3 = vpop.permute.xlu0 %1058 }
 0x248   : > { %v912_v8 = vsel %vm392_vm3, %v2701_v45, %v901_v63  ;;  %v918_v9 = vsel %vm392_vm3, %v901_v63, %v2701_v45  ;;  %v1069_v15 = vsel %vm436_vm5, %v2703_v46, %v1059_v3  ;;  %v1075_v1 = vsel %vm436_vm5, %v1059_v3, %v2703_v46  ;;  %v1261_v46 = vld [vmem:[#allocation3 + $0x8] sm:$0xff] }
 0x249   : > { %v2863_v45 = vmul.f32 %v2791_v35, %v1069_v15  ;;  %v2866_v25 = vmul.f32 %v2794_v36, %v1075_v1  ;;  %908 = vrot.lane.b32.xlu1 %v2699_v43, %s3571_s23  ;;  %994 = vrot.lane.b32.xlu0 %v2709_v47, %s3577_s25  ;;  %v2895_v56 = vmul.f32 %v2832_v42, %v918_v9 }
 0x24a   : > { %v2898_v57 = vmul.f32 %v2835_v62, %v912_v8  ;;  %1511 = vmatprep.mubr.f32.mxu1 %v1261_v46 }
 0x24b   : > { %v1129_v33 = vpop.permute.xlu1 %1128  ;;  %v903_v34 = vpop.permute.xlu0 %902 }
 0x24c   : > { %v1140_v39 = vsel %vm458_vm6, %v2711_v48, %v1129_v33  ;;  %v1146_v37 = vsel %vm458_vm6, %v1129_v33, %v2711_v48  ;;  %v913_v51 = vsel %vm392_vm3, %v2713_v49, %v903_v34  ;;  %v919_v53 = vsel %vm392_vm3, %v903_v34, %v2713_v49 }
 0x24d   : > { %v2901_v63 = vmul.f32 %v2832_v42, %v919_v53  ;;  %v2904_v3 = vmul.f32 %v2835_v62, %v913_v51  ;;  %1136 = vrot.lane.b32.xlu1 %v2699_v43, %s3572_s24  ;;  %838 = vrot.lane.b32.xlu0 %v2709_v47, %s2213_s10  ;;  %v2921_v18 = vmul.f32 %v2875_v29, %v1140_v39 }
 0x24e   : > { %v2924_v33 = vmul.f32 %v2878_v31, %v1146_v37 }
 0x24f   : > { %v689_v48 = vpop.permute.xlu1 %688  ;;  %v1131_v49 = vpop.permute.xlu0 %1130  ;;  %3588 = vst [vmem:[#allocation27_spill] sm:$0xff] %v2921_v18  ;;  %v1870_v18 = vld [vmem:[%s3503_s0 + $0x4] ss:$8 sm:$0x3] }
 0x250   : > { %v1141_v15 = vsel %vm458_vm6, %v2719_v52, %v1131_v49  ;;  %v1147_v1 = vsel %vm458_vm6, %v1131_v49, %v2719_v52  ;;  %3589 = vst [vmem:[#allocation28_spill] sm:$0xff] %v2924_v33 }
 0x251   : > { %v2927_v34 = vmul.f32 %v2875_v29, %v1141_v15  ;;  %v2930_v51 = vmul.f32 %v2878_v31, %v1147_v1  ;;  %1200 = vrot.lane.b32.xlu1 %v2567_v5, %s2219_s22  ;;  %1206 = vrot.lane.b32.xlu0 %v2633_v24, %s2219_s22 }
 0x253   : > { %3590 = vst [vmem:[#allocation29_spill] sm:$0xff] %v2927_v34  ;;  %3591 = vst [vmem:[#allocation30_spill] sm:$0xff] %v2930_v51  ;;  %v749_v39 = vpop.permute.xlu1 %748  ;;  %v691_v53 = vpop.permute.xlu0 %690 }
 0x255   : > { %1192 = vrot.lane.b32.xlu1 %v2595_v16, %s2219_s22  ;;  %1066 = vrot.lane.b32.xlu0 %v2709_v47, %s2216_s18  ;;  %s3461_s18 = scalar_lea.hbm %s3511_s8, %s1887_s19 }
 0x257   : > { %v2944_v49 = vpop.permute.xlu1 %976  ;;  %v751_v15 = vpop.permute.xlu0 %750 }
 0x259   : > { %1204 = vrot.lane.b32.xlu1 %v2627_v22, %s2219_s22  ;;  %910 = vrot.lane.b32.xlu0 %v2709_v47, %s3571_s23  ;;  %v1393_v22 = vld [vmem:[%s3508_s5 + $0x8] sm:$0xff]  ;;  %s1760_s23 = scalar_lea.sflag [#allocation5], %s311_s21 }
 0x25b   : > { %v2950_v1 = vpop.permute.xlu1 %820  ;;  %v2952_v2 = vpop.permute.xlu0 %978 }
 0x25d   : > { %972 = vrot.lane.b32.xlu1 %v2533_v50, %s3577_s25  ;;  %974 = vrot.lane.b32.xlu0 %v2537_v55, %s3577_s25  ;;  %v3022_v50 = vrot.slane %v1870_v18, %v2412_v13 }
 0x25f   : > { %v2958_v52 = vpop.permute.xlu1 %1048  ;;  %v2960_v37 = vpop.permute.xlu0 %822 }
 0x261   : > { %984 = vrot.lane.b32.xlu1 %v2567_v5, %s3577_s25  ;;  %1138 = vrot.lane.b32.xlu0 %v2709_v47, %s3572_s24  ;;  %s2140_s24 = scalar_lea.vmem %s3463_s12, 128 }
 0x262   : > { %p2141_p6 = scmp.ne.s32.totalorder %s3463_s12, %s2140_s24 }
 0x263   : > { %v2966_v8 = vpop.permute.xlu1 %892  ;;  %v2968_v9 = vpop.permute.xlu0 %1050 }
 0x264   : > { %p2142_p10 = pnand %p2141_p6, %p3659_p9 }
 0x265   : > { %1196 = vrot.lane.b32.xlu1 %v2661_v30, %s2219_s22  ;;  %986 = vrot.lane.b32.xlu0 %v2573_v7, %s3577_s25  ;;  %v3025_v7 = vrot.slane %v1870_v18, %v2414_v14  ;;  %s2144_s25 = sshll.u32 %s2221_s9, 4  ;;  %s2145_s25 = int_to_ptr.vmem [resolvable:$false] %s2144_s25 }
 0x266   : > { %p2143_p12 = pneg %p2142_p10  ;;  %s2146_s13 = scalar_lea.vmem %s2145_s25, 256 }
 0x267   : > { %v2974_v38 = vpop.permute.xlu1 %1120  ;;  %v2976_v6 = vpop.permute.xlu0 %894  ;;  %p2147_p2 = scmp.lt.s32.totalorder %s3463_s12, %s2145_s25  ;;  %p2148_p3 = scmp.lt.s32.totalorder %s2146_s13, %s2140_s24 }
 0x269   : > { %1208 = vrot.lane.b32.xlu1 %v2699_v43, %s2219_s22  ;;  %1198 = vrot.lane.b32.xlu0 %v2667_v32, %s2219_s22  ;;  %v1394_v32 = vld [vmem:[%s3508_s5 + $0x10] sm:$0xff]  ;;  %p2149_p4 = por %p2148_p3, %p2147_p2 }
 0x26b   : > { %v701_v46 = vpop.permute.xlu1 %700  ;;  %v2983_v44 = vpop.permute.xlu0 %1122  ;;  %p2150_p7 = pnand %p2149_p4, %p2143_p12 }
 0x26c   : > { %v710_v30 = vsel %vm327_vm1, %v689_v48, %v701_v46  ;;  %v716_v24 = vsel %vm327_vm1, %v701_v46, %v689_v48 }
 0x26d   : > { %1400 = vperm.xlu1 %2111, %v1392_v40   ;;  %1210 = vrot.lane.b32.xlu0 %v2709_v47, %s2219_s22  ;;  %v724_v40 = vmul.f32 %v716_v24, %v2429_v21  ;;  %v725_v46 = vmul.f32 %v710_v30, %v2425_v19  ;;  %v1396_v30 = vld [vmem:[%s3508_s5 + $0x20] sm:$0xff] }
 0x26f   : > { %v761_v4 = vpop.permute.xlu1 %760  ;;  %v703_v43 = vpop.permute.xlu0 %702 }
 0x270   : > { %v711_v0 = vsel %vm327_vm1, %v691_v53, %v703_v43  ;;  %v717_v48 = vsel %vm327_vm1, %v703_v43, %v691_v53  ;;  %v770_v34 = vsel %vm348_vm0, %v749_v39, %v761_v4  ;;  %v776_v55 = vsel %vm348_vm0, %v761_v4, %v749_v39 }
 0x271   : > { %v726_v47 = vmul.f32 %v717_v48, %v2429_v21  ;;  %v727_v16 = vmul.f32 %v711_v0, %v2425_v19  ;;  %1410 = vperm.xlu1 %2111, %v1394_v32   ;;  %1405 = vperm.xlu0 %2110, %v1393_v22   ;;  %v1395_v0 = vld [vmem:[%s3508_s5 + $0x18] sm:$0xff]  ;;  %v3032_v39 = vmul.f32 %v2729_v54, %v776_v55 }
 0x272   : > { %v3035_v4 = vmul.f32 %v2734_v59, %v770_v34 }
 0x273   : > { %v989_v43 = vpop.permute.xlu1 %988  ;;  %v763_v24 = vpop.permute.xlu0 %762  ;;  %v1908_v53 = vpack.c.bf16 %v727_v16, %v725_v46  ;;  %v1910_v48 = vpack.c.bf16 %v726_v47, %v724_v40  ;;  %v1674_v40 = vld [vmem:[%s3510_s7] sm:$0xf]  ;;  %v1397_v46 = vld [vmem:[%s3508_s5 + $0x28] sm:$0xff] }
 0x274   : > { %v771_v22 = vsel %vm348_vm0, %v751_v15, %v763_v24  ;;  %v777_v32 = vsel %vm348_vm0, %v763_v24, %v751_v15  ;;  %v998_v18 = vsel %vm414_vm4, %v2944_v49, %v989_v43  ;;  %v1004_v15 = vsel %vm414_vm4, %v989_v43, %v2944_v49 }
 0x275   : > { %v3038_v16 = vmul.f32 %v2729_v54, %v777_v32  ;;  %v3041_v47 = vmul.f32 %v2734_v59, %v771_v22  ;;  %1909 = vmatprep.subr.bf16.mxu1 %v1908_v53  ;;  %1420 = vperm.xlu1 %2111, %v1396_v30  }
 0x276   : > { %1415 = vperm.xlu0 %2110, %v1395_v0   ;;  %1911 = vmatpush1.bf16.msra.mxu1 %v1910_v48  ;;  %v1024_v0 = vmul.f32 %v3022_v50, %v998_v18  ;;  %v1025_v48 = vmul.f32 %v3025_v7, %v1004_v15 }
 0x277   : > { %v833_v55 = vpop.permute.xlu1 %832  ;;  %v991_v34 = vpop.permute.xlu0 %990 }
 0x278   : > { %v848_v49 = vsel %vm370_vm2, %v833_v55, %v2950_v1  ;;  %v999_v43 = vsel %vm414_vm4, %v2952_v2, %v991_v34  ;;  %v1005_v30 = vsel %vm414_vm4, %v991_v34, %v2952_v2  ;;  %v842_v53 = vsel %vm370_vm2, %v2950_v1, %v833_v55 }
 0x279   : > { %v1026_v22 = vmul.f32 %v3022_v50, %v999_v43  ;;  %v1027_v32 = vmul.f32 %v3025_v7, %v1005_v30  ;;  %1677 = vperm.xlu1 %2111, %v1674_v40   ;;  %v3088_v55 = vmul.f32 %v2757_v10, %v848_v49  ;;  %v3091_v34 = vmul.f32 %v2760_v11, %v842_v53 }
 0x27a   : > { %1425 = vperm.xlu0 %2110, %v1397_v46  }
 0x27b   : > { %v1970_v24 = vpack.c.bf16 %v1026_v22, %v1024_v0  ;;  %v1061_v13 = vpop.permute.xlu1 %1060  ;;  %v835_v14 = vpop.permute.xlu0 %834  ;;  %v1968_v5 = vpack.c.bf16 %v1027_v32, %v1025_v48 }
 0x27c   : > { %v1070_v2 = vsel %vm436_vm5, %v2958_v52, %v1061_v13  ;;  %v1076_v18 = vsel %vm436_vm5, %v1061_v13, %v2958_v52  ;;  %v843_v15 = vsel %vm370_vm2, %v2960_v37, %v835_v14  ;;  %v849_v1 = vsel %vm370_vm2, %v835_v14, %v2960_v37 }
 0x27d   : > { %v3094_v40 = vmul.f32 %v2757_v10, %v849_v1  ;;  %v3097_v46 = vmul.f32 %v2760_v11, %v843_v15  ;;  %1969 = vmatprep.subr.bf16.mxu0 %v1968_v5  ;;  %v3116_v49 = vmul.f32 %v2791_v35, %v1070_v2  ;;  %v3119_v30 = vmul.f32 %v2794_v36, %v1076_v18 }
 0x27e   : > { %1971 = vmatpush1.bf16.msra.mxu0 %v1970_v24 }
 0x27f   : > { %v905_v13 = vpop.permute.xlu1 %904  ;;  %v1063_v52 = vpop.permute.xlu0 %1062 }
 0x280   : > { %v914_v37 = vsel %vm392_vm3, %v2966_v8, %v905_v13  ;;  %v920_v53 = vsel %vm392_vm3, %v905_v13, %v2966_v8  ;;  %v1071_v5 = vsel %vm436_vm5, %v2968_v9, %v1063_v52  ;;  %v1077_v24 = vsel %vm436_vm5, %v1063_v52, %v2968_v9 }
 0x281   : > { %v3122_v0 = vmul.f32 %v2791_v35, %v1071_v5  ;;  %v3125_v48 = vmul.f32 %v2794_v36, %v1077_v24  ;;  %v3144_v13 = vmul.f32 %v2832_v42, %v920_v53  ;;  %v3147_v52 = vmul.f32 %v2835_v62, %v914_v37 }
 0x283   : > { %v1133_v22 = vpop.permute.xlu1 %1132  ;;  %v907_v32 = vpop.permute.xlu0 %906  ;;  %3592 = vst [vmem:[#allocation31_spill] sm:$0xff] %v3144_v13  ;;  %3593 = vst [vmem:[#allocation32_spill] sm:$0xff] %v3147_v52 }
 0x284   : > { %v1142_v2 = vsel %vm458_vm6, %v2974_v38, %v1133_v22  ;;  %v1148_v18 = vsel %vm458_vm6, %v1133_v22, %v2974_v38  ;;  %v915_v15 = vsel %vm392_vm3, %v2976_v6, %v907_v32  ;;  %v921_v1 = vsel %vm392_vm3, %v907_v32, %v2976_v6 }
 0x285   : > { %v3150_v5 = vmul.f32 %v2832_v42, %v921_v1  ;;  %v3153_v24 = vmul.f32 %v2835_v62, %v915_v15  ;;  %v3166_v32 = vmul.f32 %v2875_v29, %v1142_v2  ;;  %v3169_v15 = vmul.f32 %v2878_v31, %v1148_v18 }
 0x287   : > { %3594 = vst [vmem:[#allocation33_spill] sm:$0xff] %v3150_v5  ;;  %3595 = vst [vmem:[#allocation34_spill] sm:$0xff] %v3153_v24  ;;  %v693_v38 = vpop.permute.xlu1 %692  ;;  %v1135_v22 = vpop.permute.xlu0 %1134  ;;  %v3604_v24 = vpack.c.bf16 %v2780_v28, %v2774_v26 }
 0x288   : > { %v1143_v53 = vsel %vm458_vm6, %v2983_v44, %v1135_v22  ;;  %v1149_v37 = vsel %vm458_vm6, %v1135_v22, %v2983_v44  ;;  %3596 = vst [vmem:[#allocation35_spill] sm:$0xff] %v3166_v32  ;;  %3597 = vst [vmem:[#allocation36_spill] sm:$0xff] %v3169_v15 }
 0x289   : > { %v3172_v1 = vmul.f32 %v2875_v29, %v1143_v53  ;;  %v3175_v8 = vmul.f32 %v2878_v31, %v1149_v37 }
 0x28b   : > { %3598 = vst [vmem:[#allocation37_spill] sm:$0xff] %v3172_v1  ;;  %3599 = vst [vmem:[#allocation38_spill] sm:$0xff] %v3175_v8  ;;  %v753_v9 = vpop.permute.xlu1 %752  ;;  %v695_v14 = vpop.permute.xlu0 %694 }
 0x28f   : > { %v981_v22 = vpop.permute.xlu1 %980  ;;  %v755_v2 = vpop.permute.xlu0 %754 }
 0x293   : > { %v825_v43 = vpop.permute.xlu1 %824  ;;  %v983_v33 = vpop.permute.xlu0 %982 }
 0x297   : > { %v3181_v18 = vpop.permute.xlu1 %1052  ;;  %v3183_v51 = vpop.permute.xlu0 %826 }
 0x29b   : > { %v3185_v53 = vpop.permute.xlu1 %896  ;;  %v3187_v37 = vpop.permute.xlu0 %1054 }
 0x29f   : > { %v3189_v31 = vpop.permute.xlu1 %1124  ;;  %v3191_v6 = vpop.permute.xlu0 %898 }
 0x2a0   : > { %3600 = vst [vmem:[#allocation39_spill] sm:$0xff] %v3189_v31  ;;  %3601 = vst [vmem:[#allocation40_spill] sm:$0xff] %v3191_v6 }
 0x2a3   : > { %v705_v32 = vpop.permute.xlu1 %704  ;;  %v3193_v1 = vpop.permute.xlu0 %1126 }
 0x2a4   : > { %3602 = vst [vmem:[#allocation41_spill] sm:$0xff] %v3193_v1  ;;  %v712_v44 = vsel %vm327_vm1, %v693_v38, %v705_v32  ;;  %v718_v29 = vsel %vm327_vm1, %v705_v32, %v693_v38 }
 0x2a5   : > { %v728_v5 = vmul.f32 %v718_v29, %v2429_v21  ;;  %v729_v62 = vmul.f32 %v712_v44, %v2425_v19  ;;  %v3605_v29 = vpack.c.bf16 %v2777_v27, %v2763_v17 }
 0x2a7   : > { %v3199_v15 = vpop.permute.xlu1 %1188  ;;  %v707_v8 = vpop.permute.xlu0 %706 }
 0x2a8   : > { %3603 = vst [vmem:[#allocation42_spill] sm:$0xff] %v3199_v15  ;;  %v713_v13 = vsel %vm327_vm1, %v695_v14, %v707_v8  ;;  %v719_v31 = vsel %vm327_vm1, %v707_v8, %v695_v14 }
 0x2a9   : > { %v730_v1 = vmul.f32 %v719_v31, %v2429_v21  ;;  %v731_v42 = vmul.f32 %v713_v13, %v2425_v19  ;;  %v3607_v13 = vpack.c.bf16 %v3038_v16, %v3032_v39 }
 0x2ab   : > { %v765_v6 = vpop.permute.xlu1 %764  ;;  %v3209_v52 = vpop.permute.xlu0 %1190  ;;  %v1912_v38 = vpack.c.bf16 %v731_v42, %v729_v62  ;;  %v1914_v32 = vpack.c.bf16 %v730_v1, %v728_v5  ;;  %v3606_v62 = vpack.c.bf16 %v3041_v47, %v3035_v4 }
 0x2ac   : > { %v772_v19 = vsel %vm348_vm0, %v753_v9, %v765_v6  ;;  %v778_v21 = vsel %vm348_vm0, %v765_v6, %v753_v9 }
 0x2ad   : > { %1913 = vmatprep.subr.bf16.mxu1 %v1912_v38  ;;  %v800_v17 = vmul.f32 %v2729_v54, %v778_v21  ;;  %v801_v27 = vmul.f32 %v2734_v59, %v772_v19  ;;  %v3610_v19 = vpack.c.bf16 %v3097_v46, %v3091_v34  ;;  %v3611_v34 = vpack.c.bf16 %v3094_v40, %v3088_v55 }
 0x2ae   : > { %1915 = vmatpush1.bf16.msra.mxu1 %v1914_v32  ;;  %v3613_v55 = vpack.c.bf16 %v2863_v45, %v2857_v20  ;;  %v3615_v40 = vpack.c.bf16 %v3125_v48, %v3119_v30 }
 0x2af   : > { %v993_v15 = vpop.permute.xlu1 %992  ;;  %1917 = vmatprep.subr.bf16.mxu1 %v3604_v24  ;;  %v3214_v14 = vpop.permute.xlu0 %1202 }
 0x2b0   : > { %v1000_v6 = vsel %vm414_vm4, %v981_v22, %v993_v15  ;;  %v1006_v1 = vsel %vm414_vm4, %v993_v15, %v981_v22 }
 0x2b1   : > { %v1029_v38 = vmul.f32 %v3025_v7, %v1006_v1 }
 0x2b2   : > { %1919 = vmatpush1.bf16.msra.mxu1 %v3605_v29 }
 0x2b3   : > { %v837_v42 = vpop.permute.xlu1 %836  ;;  %1921 = vmatprep.subr.bf16.mxu1 %v3606_v62  ;;  %v767_v31 = vpop.permute.xlu0 %766 }
 0x2b4   : > { %v773_v26 = vsel %vm348_vm0, %v755_v2, %v767_v31  ;;  %v779_v28 = vsel %vm348_vm0, %v767_v31, %v755_v2  ;;  %v1028_v2 = vmul.f32 %v3022_v50, %v1000_v6  ;;  %v844_v22 = vsel %vm370_vm2, %v825_v43, %v837_v42 }
 0x2b5   : > { %v802_v8 = vmul.f32 %v2729_v54, %v779_v28  ;;  %v803_v9 = vmul.f32 %v2734_v59, %v773_v26  ;;  %v3608_v59 = vpack.c.bf16 %v2825_v61, %v2819_v60  ;;  %v850_v60 = vsel %vm370_vm2, %v837_v42, %v825_v43 }
 0x2b6   : > { %1923 = vmatpush1.bf16.msra.mxu1 %v3607_v13  ;;  %v3609_v61 = vpack.c.bf16 %v2822_v41, %v2816_v58  ;;  %v872_v58 = vmul.f32 %v2757_v10, %v850_v60  ;;  %v873_v41 = vmul.f32 %v2760_v11, %v844_v22  ;;  %v3612_v28 = vpack.c.bf16 %v2866_v25, %v2860_v23  ;;  %v3627_v22 = vld [vmem:[#allocation30_spill] sm:$0xff]  ;;  %v3628_v60 = vld [vmem:[#allocation28_spill] sm:$0xff] }
 0x2b7   : > { %v1065_v4 = vpop.permute.xlu1 %1064  ;;  %v3237_v47 = vpop.permute.xlu0 %1194  ;;  %v1924_v5 = vpack.c.bf16 %v803_v9, %v801_v27  ;;  %v1926_v24 = vpack.c.bf16 %v802_v8, %v800_v17  ;;  %v3614_v25 = vpack.c.bf16 %v2904_v3, %v2898_v57  ;;  %v3616_v13 = vpack.c.bf16 %v2901_v63, %v2895_v56  ;;  %v3622_v63 = vld [vmem:[#allocation23_spill] sm:$0xff] }
 0x2b9   : > { %1925 = vmatprep.subr.bf16.mxu1 %v1924_v5  ;;  %v3618_v5 = vld [vmem:[#allocation34_spill] sm:$0xff] }
 0x2ba   : > { %1927 = vmatpush1.bf16.msra.mxu1 %v1926_v24 }
 0x2bb   : > { %v909_v54 = vpop.permute.xlu1 %908  ;;  %1929 = vmatprep.subr.bf16.mxu1 %v3608_v59  ;;  %v995_v39 = vpop.permute.xlu0 %994  ;;  %v3621_v59 = vld [vmem:[#allocation40_spill] sm:$0xff] }
 0x2bc   : > { %v1001_v16 = vsel %vm414_vm4, %v983_v33, %v995_v39  ;;  %v1007_v44 = vsel %vm414_vm4, %v995_v39, %v983_v33  ;;  %v916_v30 = vsel %vm392_vm3, %v3185_v53, %v909_v54  ;;  %v922_v48 = vsel %vm392_vm3, %v909_v54, %v3185_v53 }
 0x2bd   : > { %v1030_v32 = vmul.f32 %v3022_v50, %v1001_v16  ;;  %v1031_v15 = vmul.f32 %v3025_v7, %v1007_v44  ;;  %v944_v54 = vmul.f32 %v3622_v63, %v922_v48  ;;  %v3624_v44 = vld [vmem:[#allocation33_spill] sm:$0xff] }
 0x2be   : > { %1931 = vmatpush1.bf16.msra.mxu1 %v3609_v61  ;;  %v3629_v61 = vpack.c.bf16 %v3627_v22, %v3628_v60  ;;  %v3645_v48 = vld [vmem:[#allocation17_spill] sm:$0xff]  ;;  %v3654_v60 = vld [vmem:[#allocation35_spill] sm:$0xff] }
 0x2bf   : > { %v1974_v29 = vpack.c.bf16 %v1030_v32, %v1028_v2  ;;  %v3261_v33 = vpop.permute.xlu1 %1136  ;;  %1933 = vmatprep.subr.bf16.mxu1 %v3610_v19  ;;  %v839_v21 = vpop.permute.xlu0 %838  ;;  %v1972_v62 = vpack.c.bf16 %v1031_v15, %v1029_v38  ;;  %v3625_v2 = vld [vmem:[#allocation31_spill] sm:$0xff]  ;;  %v3653_v22 = vld [vmem:[#allocation37_spill] sm:$0xff] }
 0x2c0   : > { %v845_v31 = vsel %vm370_vm2, %v3183_v51, %v839_v21  ;;  %v851_v43 = vsel %vm370_vm2, %v839_v21, %v3183_v51  ;;  %v3626_v38 = vpack.c.bf16 %v3624_v44, %v3625_v2  ;;  %v1873_v32 = vld [vmem:[%s3503_s0 + $0x7] ss:$8 sm:$0x3] }
 0x2c1   : > { %v874_v42 = vmul.f32 %v2757_v10, %v851_v43  ;;  %v875_v26 = vmul.f32 %v2760_v11, %v845_v31  ;;  %1973 = vmatprep.subr.bf16.mxu0 %v1972_v62  ;;  %v1072_v10 = vsel %vm436_vm5, %v3181_v18, %v1065_v4  ;;  %v1078_v11 = vsel %vm436_vm5, %v1065_v4, %v3181_v18  ;;  %v3630_v62 = vld [vmem:[#allocation39_spill] sm:$0xff]  ;;  %v3631_v43 = vld [vmem:[#allocation42_spill] sm:$0xff] }
 0x2c2   : > { %1935 = vmatpush1.bf16.msra.mxu1 %v3611_v34  ;;  %1975 = vmatpush1.bf16.msra.mxu0 %v1974_v29  ;;  %v1100_v45 = vmul.f32 %v2791_v35, %v1072_v10  ;;  %v1101_v9 = vmul.f32 %v2794_v36, %v1078_v11  ;;  %v1144_v31 = vsel %vm458_vm6, %v3630_v62, %v3261_v33  ;;  %v3634_v34 = vld [vmem:[#allocation11_spill] sm:$0xff] }
 0x2c3   : > { %v3279_v46 = vpop.permute.xlu1 %1200  ;;  %1977 = vmatprep.subr.bf16.mxu0 %v3612_v28  ;;  %v3284_v51 = vpop.permute.xlu0 %1206  ;;  %v1936_v17 = vpack.c.bf16 %v875_v26, %v873_v41  ;;  %v1938_v27 = vpack.c.bf16 %v874_v42, %v872_v58  ;;  %v3632_v41 = vld [vmem:[#allocation13_spill] sm:$0xff]  ;;  %v3633_v42 = vld [vmem:[#allocation14_spill] sm:$0xff]  ;;  %v3635_v28 = vld [vmem:[#allocation12_spill] sm:$0xff]  ;;  %v1150_v11 = vsel %vm458_vm6, %v3261_v33, %v3630_v62 }
 0x2c4   : > { %v1218_v58 = vsel %vm480_vm7, %v3279_v46, %v3631_v43  ;;  %v1952_v26 = vpack.c.bf16 %v3633_v42, %v3632_v41 }
 0x2c5   : > { %1937 = vmatprep.subr.bf16.mxu1 %v1936_v17  ;;  %v1954_v17 = vpack.c.bf16 %v3635_v28, %v3634_v34 }
 0x2c6   : > { %1939 = vmatpush1.bf16.msra.mxu1 %v1938_v27  ;;  %1979 = vmatpush1.bf16.msra.mxu0 %v3613_v55  ;;  %v3636_v27 = vld [vmem:[#allocation10_spill] sm:$0xff]  ;;  %v3637_v55 = vld [vmem:[#allocation29_spill] sm:$0xff] }
 0x2c7   : > { %v3295_v23 = vpop.permute.xlu1 %1192  ;;  %1941 = vmatprep.subr.bf16.mxu1 %v3614_v25  ;;  %1981 = vmatprep.subr.bf16.mxu0 %v3615_v40  ;;  %v1067_v8 = vpop.permute.xlu0 %1066  ;;  %v3360_v10 = vrot.slane %v1873_v32, %v3636_v27  ;;  %v3638_v25 = vld [vmem:[#allocation27_spill] sm:$0xff] }
 0x2c8   : > { %v1073_v18 = vsel %vm436_vm5, %v3187_v37, %v1067_v8  ;;  %v1079_v20 = vsel %vm436_vm5, %v1067_v8, %v3187_v37  ;;  %v3617_v37 = vpack.c.bf16 %v3122_v0, %v3116_v49  ;;  %v3623_v49 = vld [vmem:[#allocation24_spill] sm:$0xff]  ;;  %v3639_v40 = vpack.c.bf16 %v3637_v55, %v3638_v25  ;;  %v3640_v8 = vld [vmem:[#allocation15_spill] sm:$0xff] }
 0x2c9   : > { %v1102_v57 = vmul.f32 %v2791_v35, %v1073_v18  ;;  %v1103_v3 = vmul.f32 %v2794_v36, %v1079_v20  ;;  %v3619_v36 = vld [vmem:[#allocation32_spill] sm:$0xff]  ;;  %v945_v0 = vmul.f32 %v3623_v49, %v916_v30 }
 0x2ca   : > { %1943 = vmatpush1.bf16.msra.mxu1 %v3616_v13  ;;  %1983 = vmatpush1.bf16.msra.mxu0 %v3617_v37  ;;  %v3620_v24 = vpack.c.bf16 %v3618_v5, %v3619_v36  ;;  %v3641_v18 = vld [vmem:[#allocation16_spill] sm:$0xff]  ;;  %v3646_v13 = vld [vmem:[#allocation18_spill] sm:$0xff] }
 0x2cb   : > { %v1986_v4 = vpack.c.bf16 %v1102_v57, %v1100_v45  ;;  %v1205_v35 = vpop.permute.xlu1 %1204  ;;  %v911_v6 = vpop.permute.xlu0 %910  ;;  %v1984_v1 = vpack.c.bf16 %v1103_v3, %v1101_v9  ;;  %v1958_v20 = vpack.c.bf16 %v3641_v18, %v3640_v8  ;;  %v1219_v45 = vsel %vm480_vm7, %v3214_v14, %v3209_v52  ;;  %v3642_v57 = vld [vmem:[#allocation38_spill] sm:$0xff]  ;;  %v3643_v3 = vld [vmem:[#allocation36_spill] sm:$0xff]  ;;  %v3656_v8 = vld [vmem:[#allocation19_spill] sm:$0xff] }
 0x2cc   : > { %1945 = vmatprep.subr.bf16.mxu1 %v3620_v24  ;;  %v917_v53 = vsel %vm392_vm3, %v3621_v59, %v911_v6  ;;  %v923_v56 = vsel %vm392_vm3, %v911_v6, %v3621_v59  ;;  %v3644_v30 = vpack.c.bf16 %v3642_v57, %v3643_v3  ;;  %v1956_v37 = vpack.c.bf16 %v3646_v13, %v3645_v48  ;;  %v3648_v5 = vld [vmem:[#allocation22_spill] sm:$0xff]  ;;  %v3649_v24 = vld [vmem:[#allocation25_spill] sm:$0xff]  ;;  %v3657_v18 = vld [vmem:[#allocation20_spill] sm:$0xff] }
 0x2cd   : > { %v946_v39 = vmul.f32 %v3622_v63, %v923_v56  ;;  %v947_v16 = vmul.f32 %v3623_v49, %v917_v53  ;;  %1985 = vmatprep.subr.bf16.mxu0 %v1984_v1  ;;  %v1172_v6 = vmul.f32 %v3649_v24, %v1144_v31  ;;  %v1237_v1 = vmul.f32 %v3360_v10, %v1218_v58  ;;  %v3650_v59 = vld [vmem:[#allocation41_spill] sm:$0xff]  ;;  %v3651_v63 = vld [vmem:[#allocation26_spill] sm:$0xff] }
 0x2ce   : > { %1947 = vmatpush1.bf16.msra.mxu1 %v3626_v38  ;;  %1987 = vmatpush1.bf16.msra.mxu0 %v1986_v4  ;;  %v3647_v4 = vld [vmem:[#allocation21_spill] sm:$0xff]  ;;  %v1212_v49 = vsel %vm480_vm7, %v3631_v43, %v3279_v46  ;;  %v1239_v2 = vmul.f32 %v3360_v10, %v1219_v45  ;;  %v1220_v38 = vsel %vm480_vm7, %v1205_v35, %v3295_v23 }
 0x2cf   : > { %v973_v15 = vpop.permute.xlu1 %972  ;;  %1989 = vmatprep.subr.bf16.mxu0 %v3629_v61  ;;  %v975_v29 = vpop.permute.xlu0 %974  ;;  %v1948_v19 = vpack.c.bf16 %v947_v16, %v945_v0  ;;  %v1950_v21 = vpack.c.bf16 %v946_v39, %v944_v54  ;;  %v1960_v36 = vpack.c.bf16 %v3648_v5, %v3647_v4  ;;  %v1173_v54 = vmul.f32 %v3651_v63, %v1150_v11  ;;  %v3652_v16 = vld [vmem:[#allocation9_spill] sm:$0xff]  ;;  %v1260_v5 = vld [vmem:[#allocation3] sm:$0xff] }
 0x2d0   : > { %v1229_v44 = vrot.slane %v1873_v32, %v3652_v16  ;;  %v3655_v61 = vpack.c.bf16 %v3653_v22, %v3654_v60  ;;  %v1213_v46 = vsel %vm480_vm7, %v3209_v52, %v3214_v14  ;;  %v1221_v32 = vsel %vm480_vm7, %v3284_v51, %v3237_v47  ;;  %v1275_v16 = vld [vmem:[#allocation3 + $0x78] sm:$0xff]  ;;  %v1280_v60 = vld [vmem:[#allocation3 + $0xa0] sm:$0xff] }
 0x2d1   : > { %1949 = vmatprep.subr.bf16.mxu1 %v1948_v19  ;;  %v2000_v42 = vpack.c.bf16 %v1239_v2, %v1237_v1  ;;  %v1214_v52 = vsel %vm480_vm7, %v3295_v23, %v1205_v35  ;;  %v1241_v14 = vmul.f32 %v3360_v10, %v1220_v38  ;;  %v1243_v27 = vmul.f32 %v3360_v10, %v1221_v32  ;;  %v1264_v1 = vld [vmem:[#allocation3 + $0x20] sm:$0xff]  ;;  %v1274_v2 = vld [vmem:[#allocation3 + $0x70] sm:$0xff]  ;;  %v1281_v38 = vld [vmem:[#allocation3 + $0xa8] sm:$0xff] }
 0x2d2   : > { %1951 = vmatpush1.bf16.msra.mxu1 %v1950_v21  ;;  %1991 = vmatpush1.bf16.msra.mxu0 %v3639_v40  ;;  %v1236_v43 = vmul.f32 %v1229_v44, %v1212_v49  ;;  %v1238_v28 = vmul.f32 %v1229_v44, %v1213_v46  ;;  %v1240_v25 = vmul.f32 %v1229_v44, %v1214_v52  ;;  %v1272_v49 = vld [vmem:[#allocation3 + $0x60] sm:$0xff]  ;;  %v1279_v22 = vld [vmem:[#allocation3 + $0x98] sm:$0xff]  ;;  %v1282_v32 = vld [vmem:[#allocation3 + $0xb0] sm:$0xff] }
 0x2d3   : > { %v985_v9 = vpop.permute.xlu1 %984  ;;  %1953 = vmatprep.subr.bf16.mxu1 %v1952_v26  ;;  %1993 = vmatprep.subr.bf16.mxu0 %v3644_v30  ;;  %v1139_v33 = vpop.permute.xlu0 %1138  ;;  %v2004_v45 = vpack.c.bf16 %v1243_v27, %v1241_v14  ;;  %v1283_v46 = vld [vmem:[#allocation3 + $0xb8] sm:$0xff] }
 0x2d4   : > { %v1145_v53 = vsel %vm458_vm6, %v3650_v59, %v1139_v33  ;;  %v1151_v56 = vsel %vm458_vm6, %v1139_v33, %v3650_v59  ;;  %v1002_v58 = vsel %vm414_vm4, %v985_v9, %v973_v15  ;;  %v996_v23 = vsel %vm414_vm4, %v973_v15, %v985_v9  ;;  %v1269_v59 = vld [vmem:[#allocation3 + $0x48] sm:$0xff] }
 0x2d5   : > { %v1174_v0 = vmul.f32 %v3649_v24, %v1145_v53  ;;  %v1175_v39 = vmul.f32 %v3651_v63, %v1151_v56  ;;  %v1021_v35 = vmul.f32 %v3025_v7, %v1002_v58  ;;  %v2002_v55 = vpack.c.bf16 %v1238_v28, %v1236_v43  ;;  %v1267_v53 = vld [vmem:[#allocation3 + $0x38] sm:$0xff]  ;;  %v1266_v56 = vld [vmem:[#allocation3 + $0x30] sm:$0xff]  ;;  %v1273_v63 = vld [vmem:[#allocation3 + $0x68] sm:$0xff] }
 0x2d6   : > { %1955 = vmatpush1.bf16.msra.mxu1 %v1954_v17  ;;  %1995 = vmatpush1.bf16.msra.mxu0 %v3655_v61  ;;  %v1215_v17 = vsel %vm480_vm7, %v3237_v47, %v3284_v51  ;;  %v1962_v47 = vpack.c.bf16 %v3657_v18, %v3656_v8  ;;  %v1020_v57 = vmul.f32 %v3022_v50, %v996_v23  ;;  %v1278_v61 = vld [vmem:[#allocation3 + $0x90] sm:$0xff] }
 0x2d7   : > { %v1998_v19 = vpack.c.bf16 %v1174_v0, %v1172_v6  ;;  %v1197_v21 = vpop.permute.xlu1 %1196  ;;  %1957 = vmatprep.subr.bf16.mxu1 %v1956_v37  ;;  %v987_v62 = vpop.permute.xlu0 %986  ;;  %v1996_v31 = vpack.c.bf16 %v1175_v39, %v1173_v54  ;;  %v1242_v51 = vmul.f32 %v1229_v44, %v1215_v17  ;;  %v1265_v6 = vld [vmem:[#allocation3 + $0x28] sm:$0xff]  ;;  %v1271_v54 = vld [vmem:[#allocation3 + $0x58] sm:$0xff]  ;;  %v1270_v0 = vld [vmem:[#allocation3 + $0x50] sm:$0xff] }
 0x2d8   : > { %v1003_v41 = vsel %vm414_vm4, %v987_v62, %v975_v29  ;;  %v997_v26 = vsel %vm414_vm4, %v975_v29, %v987_v62  ;;  %v1277_v39 = vld [vmem:[#allocation3 + $0x88] sm:$0xff] }
 0x2d9   : > { %v1023_v34 = vmul.f32 %v3025_v7, %v1003_v41  ;;  %1997 = vmatprep.subr.bf16.mxu0 %v1996_v31  ;;  %v1022_v40 = vmul.f32 %v3022_v50, %v997_v26  ;;  %v2006_v3 = vpack.c.bf16 %v1242_v51, %v1240_v25 }
 0x2da   : > { %1959 = vmatpush1.bf16.msra.mxu1 %v1958_v20  ;;  %1999 = vmatpush1.bf16.msra.mxu0 %v1998_v19  ;;  %v3658_v19 = vmov 0.0  }
 0x2db   : > { %v1209_v11 = vpop.permute.xlu1 %1208  ;;  %1961 = vmatprep.subr.bf16.mxu1 %v1960_v36  ;;  %2001 = vmatprep.subr.bf16.mxu0 %v2000_v42  ;;  %v1199_v29 = vpop.permute.xlu0 %1198  ;;  %v1964_v20 = vpack.c.bf16 %v1023_v34, %v1021_v35  ;;  %v1966_v48 = vpack.c.bf16 %v1022_v40, %v1020_v57 }
 0x2dc   : > { %v1216_v15 = vsel %vm480_vm7, %v1197_v21, %v1209_v11  ;;  %v1222_v7 = vsel %vm480_vm7, %v1209_v11, %v1197_v21 }
 0x2dd   : > { %v1244_v50 = vmul.f32 %v1229_v44, %v1216_v15  ;;  %v1245_v13 = vmul.f32 %v3360_v10, %v1222_v7 }
 0x2de   : > { %1963 = vmatpush1.bf16.msra.mxu1 %v1962_v47  ;;  %2003 = vmatpush1.bf16.msra.mxu0 %v2002_v55 }
 0x2df   : > { %1965 = vmatprep.subr.bf16.mxu1 %v1964_v20  ;;  %2005 = vmatprep.subr.bf16.mxu0 %v2004_v45  ;;  %v1211_v9 = vpop.permute.xlu0 %1210 }
 0x2e0   : > { %v1217_v30 = vsel %vm480_vm7, %v1199_v29, %v1211_v9  ;;  %v1223_v33 = vsel %vm480_vm7, %v1211_v9, %v1199_v29 }
 0x2e1   : > { %v1246_v37 = vmul.f32 %v1229_v44, %v1217_v30  ;;  %v1247_v4 = vmul.f32 %v3360_v10, %v1223_v33  ;;  %v1268_v10 = vld [vmem:[#allocation3 + $0x40] sm:$0xff] }
 0x2e2   : > { %1967 = vmatpush1.bf16.msra.mxu1 %v1966_v48  ;;  %2007 = vmatpush1.bf16.msra.mxu0 %v2006_v3  ;;  %v1276_v44 = vld [vmem:[#allocation3 + $0x80] sm:$0xff] }
 0x2e3   : > { %v2010_v36 = vpack.c.bf16 %v1246_v37, %v1244_v50  ;;  %v2008_v24 = vpack.c.bf16 %v1247_v4, %v1245_v13 }
 0x2e5   : > { %1512 = vmatmul.mubr.f32.vlgmr.msra.gmra.mrb[0].mxu1 %v1260_v5  ;;  %2009 = vmatprep.subr.bf16.mxu0 %v2008_v24 }
 0x2e6   : > { %2011 = vmatpush1.bf16.msra.mxu0 %v2010_v36  ;;  %1517 = vmatprep.mubr.f32.mxu1 %v1265_v6 }
 0x2e9   : > { %1518 = vmatmul.mubr.f32.gmra.mrb[2].mxu1 %v1264_v1  ;;  %1613 = vmatmul.mubr.f32.vlgmr.msra.gmra.mrb[12].mxu0 %v1262_v12 }
 0x2ea   : > { %1523 = vmatprep.mubr.f32.mxu1 %v1269_v59  ;;  %1875 = vmatprep.mubr.msk.f32.mxu0 %vm1428_vm9, %v1267_v53 }
 0x2ec   : > { %v1401_v31 = vpop.permute.xlu1 %1400 }
 0x2ed   : > { %1524 = vmatmul.mubr.f32.gmra.mrb[4].mxu1 %v1268_v10  ;;  %1619 = vmatmul.mubr.f32.gmra.mrb[14].mxu0 %v1266_v56 }
 0x2ee   : > { %1529 = vmatprep.mubr.f32.mxu1 %v1273_v63  ;;  %1876 = vmatprep.mubr.msk.f32.mxu0 %vm1428_vm9, %v1271_v54 }
 0x2f0   : > { %v1406_v34 = vpop.permute.xlu0 %1405  ;;  %v1411_v40 = vpop.permute.xlu1 %1410 }
 0x2f1   : > { %1530 = vmatmul.mubr.f32.gmra.mrb[6].mxu1 %v1272_v49  ;;  %1625 = vmatmul.mubr.f32.gmra.mrb[16].mxu0 %v1270_v0 }
 0x2f2   : > { %1535 = vmatprep.mubr.f32.mxu1 %v1277_v39  ;;  %1877 = vmatprep.mubr.msk.f32.mxu0 %vm1428_vm9, %v1275_v16 }
 0x2f4   : > { %v1421_v56 = vpop.permute.xlu1 %1420 }
 0x2f5   : > { %1536 = vmatmul.mubr.f32.gmra.mrb[8].mxu1 %v1276_v44  ;;  %1631 = vmatmul.mubr.f32.gmra.mrb[18].mxu0 %v1274_v2  ;;  %v1416_v48 = vpop.permute.xlu0 %1415 }
 0x2f6   : > { %1541 = vmatprep.mubr.f32.mxu1 %v1281_v38  ;;  %1878 = vmatprep.mubr.msk.f32.mxu0 %vm1428_vm9, %v1279_v22 }
 0x2f9   : > { %1542 = vmatmul.mubr.f32.gmra.mrb[10].mxu1 %v1280_v60  ;;  %1637 = vmatmul.mubr.f32.gmra.mrb[20].mxu0 %v1278_v61 }
 0x2fa   : > { %1879 = vmatprep.mubr.msk.f32.mxu0 %vm1428_vm9, %v1283_v46 }
 0x2fd   : > { %1643 = vmatmul.mubr.f32.gmra.mrb[22].mxu0 %v1282_v32  ;;  %v1426_v32 = vpop.permute.xlu0 %1425 }
 0x2fe   : > { %1747 = vmatprep.mubr.f32.mxu0 %v3658_v19 }
 0x3b8   : > { %v1513_v21 = vpop.f32.mrb[0].mxu1 }
 0x3b9   : > { %v1515_v62 = vpop.f32.mrb[1].mxu1  ;;  %v1514_v43 = vadd.f32 %v1513_v21, %v1401_v31 }
 0x3ba   : > { %v1516_v58 = vadd.f32 %v1515_v62, %v1401_v31 }
 0x3bc   : > { %v1519_v41 = vpop.f32.mrb[2].mxu1  ;;  %v1614_v42 = vpop.f32.mrb[12].mxu0 }
 0x3bd   : > { %v1615_v52 = vadd.f32 %v1614_v42, %v1514_v43  ;;  %v1521_v14 = vpop.f32.mrb[3].mxu1  ;;  %v1616_v26 = vpop.f32.mrb[13].mxu0  ;;  %v1520_v17 = vadd.f32 %v1519_v41, %v1406_v34 }
 0x3be   : > { %v1617_v28 = vadd.f32 %v1616_v26, %v1516_v58  ;;  %v1522_v27 = vadd.f32 %v1521_v14, %v1406_v34 }
 0x3bf   : > { %v1649_v11 = vmul.f32 0.2, %v1615_v52 }
 0x3c0   : > { %v1525_v23 = vpop.f32.mrb[4].mxu1  ;;  %v1620_v35 = vpop.f32.mrb[14].mxu0  ;;  %v1650_v8 = vmul.f32 0.2, %v1617_v28 }
 0x3c1   : > { %v1621_v29 = vadd.f32 %v1620_v35, %v1520_v17  ;;  %v1527_v55 = vpop.f32.mrb[5].mxu1  ;;  %v1622_v25 = vpop.f32.mrb[15].mxu0  ;;  %v1526_v47 = vadd.f32 %v1525_v23, %v1411_v40  ;;  %v1661_v7 = vmax.f32 %v1615_v52, %v1649_v11 }
 0x3c2   : > { %v1623_v18 = vadd.f32 %v1622_v25, %v1522_v27  ;;  %v1528_v20 = vadd.f32 %v1527_v55, %v1411_v40  ;;  %v1662_v50 = vmax.f32 %v1617_v28, %v1650_v8  ;;  %v1673_v40 = vld [vmem:[%s3509_s6] sm:$0xf]  ;;  %v1678_v8 = vpop.permute.xlu1 %1677 }
 0x3c3   : > { %v1651_v51 = vmul.f32 0.2, %v1621_v29 }
 0x3c4   : > { %v1652_v45 = vmul.f32 0.2, %v1623_v18  ;;  %v1531_v57 = vpop.f32.mrb[6].mxu1  ;;  %v1626_v15 = vpop.f32.mrb[16].mxu0 }
 0x3c5   : > { %v1663_v9 = vmax.f32 %v1621_v29, %v1651_v51  ;;  %v1627_v3 = vadd.f32 %v1626_v15, %v1526_v47  ;;  %v1533_v30 = vpop.f32.mrb[7].mxu1  ;;  %v1628_v33 = vpop.f32.mrb[17].mxu0  ;;  %v1532_v5 = vadd.f32 %v1531_v57, %v1416_v48 }
 0x3c6   : > { %v1664_v13 = vmax.f32 %v1623_v18, %v1652_v45  ;;  %v1629_v37 = vadd.f32 %v1628_v33, %v1528_v20  ;;  %v1534_v36 = vadd.f32 %v1533_v30, %v1416_v48 }
 0x3c7   : > { %v2014_v4 = vpack.c.bf16 %v1663_v9, %v1661_v7  ;;  %v1653_v12 = vmul.f32 0.2, %v1627_v3 }
 0x3c8   : > { %v1537_v24 = vpop.f32.mrb[8].mxu1  ;;  %v1632_v6 = vpop.f32.mrb[18].mxu0  ;;  %v2012_v1 = vpack.c.bf16 %v1664_v13, %v1662_v50  ;;  %v1654_v63 = vmul.f32 0.2, %v1629_v37 }
 0x3c9   : > { %v1633_v59 = vadd.f32 %v1632_v6, %v1532_v5  ;;  %v1539_v53 = vpop.f32.mrb[9].mxu1  ;;  %v1634_v10 = vpop.f32.mrb[19].mxu0  ;;  %v1538_v49 = vadd.f32 %v1537_v24, %v1421_v56  ;;  %v1665_v38 = vmax.f32 %v1627_v3, %v1653_v12 }
 0x3ca   : > { %v1635_v54 = vadd.f32 %v1634_v10, %v1534_v36  ;;  %2013 = vmatprep.subr.bf16.mxu0 %v2012_v1  ;;  %v1540_v39 = vadd.f32 %v1539_v53, %v1421_v56  ;;  %v1666_v19 = vmax.f32 %v1629_v37, %v1654_v63 }
 0x3cb   : > { %v1655_v0 = vmul.f32 0.2, %v1633_v59  ;;  %2015 = vmatpush1.bf16.msra.mxu0 %v2014_v4 }
 0x3cc   : > { %v1656_v16 = vmul.f32 0.2, %v1635_v54  ;;  %v1543_v44 = vpop.f32.mrb[10].mxu1  ;;  %v1638_v2 = vpop.f32.mrb[20].mxu0 }
 0x3cd   : > { %v1667_v22 = vmax.f32 %v1633_v59, %v1655_v0  ;;  %v1639_v60 = vadd.f32 %v1638_v2, %v1538_v49  ;;  %v1545_v61 = vpop.f32.mrb[11].mxu1  ;;  %v1640_v46 = vpop.f32.mrb[21].mxu0  ;;  %v1544_v43 = vadd.f32 %v1543_v44, %v1426_v32 }
 0x3ce   : > { %v1668_v21 = vmax.f32 %v1635_v54, %v1656_v16  ;;  %v1641_v62 = vadd.f32 %v1640_v46, %v1540_v39  ;;  %v1546_v58 = vadd.f32 %v1545_v61, %v1426_v32 }
 0x3cf   : > { %v2018_v31 = vpack.c.bf16 %v1667_v22, %v1665_v38  ;;  %v1657_v52 = vmul.f32 0.2, %v1639_v60 }
 0x3d0   : > { %v1644_v41 = vpop.f32.mrb[22].mxu0  ;;  %v2016_v42 = vpack.c.bf16 %v1668_v21, %v1666_v19  ;;  %v1658_v34 = vmul.f32 0.2, %v1641_v62 }
 0x3d1   : > { %v1645_v14 = vadd.f32 %v1644_v41, %v1544_v43  ;;  %v1646_v26 = vpop.f32.mrb[23].mxu0  ;;  %v1669_v23 = vmax.f32 %v1639_v60, %v1657_v52 }
 0x3d2   : > { %v1647_v28 = vadd.f32 %v1646_v26, %v1546_v58  ;;  %2017 = vmatprep.subr.bf16.mxu0 %v2016_v42  ;;  %v1670_v11 = vmax.f32 %v1641_v62, %v1658_v34 }
 0x3d3   : > { %v1659_v17 = vmul.f32 0.2, %v1645_v14  ;;  %2019 = vmatpush1.bf16.msra.mxu0 %v2018_v31 }
 0x3d4   : > { %v1660_v27 = vmul.f32 0.2, %v1647_v28 }
 0x3d5   : > { %v1671_v35 = vmax.f32 %v1645_v14, %v1659_v17 }
 0x3d6   : > { %v1672_v29 = vmax.f32 %v1647_v28, %v1660_v27 }
 0x3d7   : > { %v2022_v55 = vpack.c.bf16 %v1671_v35, %v1669_v23 }
 0x3d8   : > { %v2020_v25 = vpack.c.bf16 %v1672_v29, %v1670_v11 }
 0x3da   : > { %2021 = vmatprep.subr.bf16.mxu0 %v2020_v25 }
 0x3db   : > { %2023 = vmatpush1.bf16.msra.mxu0 %v2022_v55 }
 0x3de   : > { %1880 = vmatmul.mubr.msk.f32.vlgmr.msra.gmra.mrb[24].mxu0 %vm1428_vm9, %v1673_v40 }
 0x4b1   : > { %v1749_v18 = vpop.f32.mrb[24].mxu0 }
 0x4b2   : > { %v1750_v47 = vadd.f32 %v1749_v18, %v1678_v8  ;;  %v1751_v51 = vpop.f32.mrb[25].mxu0 }
 0x4b3   : > { %v1752_v20 = vadd.f32 %v1751_v51, %v1678_v8 }
 0x4b5   : > { %v1756_v45 = vcombine.low %v1750_v47, %v1752_v20 }
 0x4b7   : > { %1758 = vst [vmem:[%s313_s20] sm:$0xff] %v1756_v45 }
 0x4b8   : > { %2153 = shalt.err (!%p2150_p7)
}
 0x4b9   : > { %s2154_s22 = scalar_lea.hbm %s3461_s18, 128  ;;  %s2158_s19 = scalar_lea.hbm %s3511_s8, 256 }
 0x4ba   : > { %p2155_p8 = scmp.ne.s32.totalorder %s3461_s18, %s2154_s22  ;;  %p2159_p1 = scmp.lt.u32.totalorder %s3461_s18, %s3511_s8 }
 0x4bb   : > { %p2160_p0 = scmp.lt.u32.totalorder %s2158_s19, %s2154_s22  ;;  %p2162_p6 = scmp.lt.u32.totalorder %s2154_s22, %s3461_s18 }
 0x4bc   : > { %p2156_p11 = pnand %p2155_p8, %p3659_p9 }
 0x4bd   : > { %p2161_p5 = por %p2160_p0, %p2159_p1 }
 0x4be   : > { %p2157_p13 = pneg %p2156_p11 }
 0x4bf   : > { %p2163_p10 = por %p2162_p6, %p2161_p5 }
 0x4c1   : > { %p2164_p12 = pnand %p2163_p10, %p2157_p13 }
 0x4c3   : > { %2167 = shalt.err (!%p2164_p12)
}
 0x4c4   : > { %2052 = dma.vmem_to_hbm [thread:$0]  (%p3659_p9), %s3463_s12, 128, %s3461_s18, %s1760_s23  }
 0x4c5 PF: > { %p2064_p2 = scmp.ge.s32.totalorder %s2206_s30, 2  ;;  %s1786_s10 = sand.u32 1, %s2194_s27  }
 0x4c6   : > { %p3660_p3 = scmp.ne.s32.totalorder %s3561_s16, 0  ;;  %s1787_s24 = scalar_lea.sflag [#allocation5], %s1786_s10 }
 0x4c8   : > { %p2059_p4 = pnand %p2064_p2, %p3660_p3 }
 0x4ca   : > { %2189 = dma.done.wait (!%p2059_p4), %s1787_s24, 128  }
 0x4cb   : > { %2191 = vsyncadd (!%p2059_p4), %s1787_s24, 4294967168  ;;  %p19_p7 = scmp.ge.s32.totalorder %s2292_s11, 4   ;;  %s3661_s27 = smov %s2198_s28 }
 0x4cc   : > { %s3662_s28 = smov %s2202_s29  ;;  %s3663_s29 = smov %s2303_s14 }
 0x4cd   : > { %s3664_s30 = smov %s2292_s11  ;;  %21 = sbr.rel (!%p19_p7) target bundleno = 4 (0x4), region = 99 }
 0x4d4   :  { %1792 = vsyncpa [#allocation4], 1 }
 0x4d5   :  { %1794 = vsyncpa [#allocation4 + $0x1], 1 }
 0x4d6   :  { %1795 = vsyncpa [#allocation5], 1 }
 0x4d7   :  { %1797 = vsyncpa [#allocation5 + $0x1], 1 }

</bundles_post_ra>
